<compile_context>
chip_gen: v7x
topology: tpu7x:2x2x1
jax: 0.10.0
libtpu: 0.0.40
codegen_flags: <defaults>
</compile_context>

<pallas_src>
import functools

import jax
import jax.numpy as jnp
from jax.experimental import pallas as pl
from jax.experimental.pallas import tpu as pltpu


def _sublane_multiple(dtype) -> int:
    # Min sublane tile: f32 -> 8, bf16 -> 16, int8/fp8 -> 32.
    return 32 // jnp.dtype(dtype).itemsize


def _seq_loss_kernel(*refs, weights, max_flow_sq, h_total, tile_h):
    """refs = (pred_0 .. pred_{N-1}, gt, valid, out)."""
    n = len(weights)
    pred_refs = refs[:n]
    gt_ref = refs[n]
    valid_ref = refs[n + 1]
    out_ref = refs[n + 2]

    # Inputs stream in their native dtype; upcast per-tile (free vs. DMA bound).
    gt = gt_ref[...].astype(jnp.float32)           # (B, C, TH, W)
    valid = valid_ref[...].astype(jnp.float32)     # (B, 1, TH, W)

    # Squared magnitude over the (untiled) channel axis: cheap cross-vreg add.
    # Compare against max_flow**2 instead of taking a sqrt.
    mag_sq = jnp.sum(gt * gt, axis=1, keepdims=True)             # (B, 1, TH, W)

    # Ragged last tile (no wrapper padding): rows >= H hold unspecified data.
    rows_left = h_total - pl.program_id(0) * tile_h
    row_idx = jax.lax.broadcasted_iota(jnp.int32, mag_sq.shape, 2)
    mask = jnp.logical_and(valid >= 0.5, mag_sq < max_flow_sq)
    mask = jnp.logical_and(mask, row_idx < rows_left)            # (B, 1, TH, W)

    # Per prediction: |diff| -> channel-sum -> masked select -> reduce.
    # weights already include gamma^(N-1-i) / (B*C*H*W); no full-tile wsum temp.
    total = jnp.float32(0.0)
    for i in range(n):
        diff = jnp.abs(pred_refs[i][...].astype(jnp.float32) - gt)   # (B,C,TH,W)
        csum = jnp.sum(diff, axis=1, keepdims=True)                  # (B,1,TH,W)
        # jnp.where (not *) so out-of-range rows that decode to NaN stay out.
        total = total + weights[i] * jnp.sum(jnp.where(mask, csum, 0.0))

    out_ref[...] = jnp.broadcast_to(total, out_ref.shape).astype(jnp.float32)


def _vmem_sizes():
    try:
        physical = int(pltpu.get_tpu_info().vmem_capacity_bytes)
    except Exception:
        physical = 64 * 1024 * 1024   # conservative fallback (v7x per-TC VMEM)
    # Block budget: <= ~48 MiB on v7x (64 MiB VMEM), up to 96 MiB on v5e/v6e.
    budget = min(int(physical * 0.75), 96 * 1024 * 1024)
    vmem_limit = int(min(physical * 0.9, budget + (16 << 20)))
    return budget, vmem_limit


def _select_tile_h(H, sublane_mult, bytes_per_row, budget, tile_h_override):
    if tile_h_override is not None:
        th = int(tile_h_override)
        if th >= H:
            return H
        return max(sublane_mult, (th // sublane_mult) * sublane_mult)
    if H <= sublane_mult:
        return H                                    # single full-height block
    tile_h_max = max(
        sublane_mult,
        (budget // max(1, bytes_per_row)) // sublane_mult * sublane_mult)
    # Largest tile that fits the VMEM budget while giving an even tile count
    # (keeps both v7x TensorCores busy on the "parallel" grid axis; on
    # v5e/v6e the one extra grid step is ~0.35 us, i.e. negligible).
    nt = 2
    cand = pl.cdiv(pl.cdiv(H, nt), sublane_mult) * sublane_mult
    while cand > tile_h_max:
        nt += 2
        cand = pl.cdiv(pl.cdiv(H, nt), sublane_mult) * sublane_mult
    tile_h = cand
    num_tiles = pl.cdiv(H, tile_h)
    if num_tiles > 1 and num_tiles % 2 == 1:
        alt = pl.cdiv(pl.cdiv(H, num_tiles + 1), sublane_mult) * sublane_mult
        if alt <= tile_h_max and pl.cdiv(H, alt) % 2 == 0:
            tile_h = alt
    return tile_h


def sequence_loss(flow_preds, flow_gt, valid, *, gamma, max_flow, tile_h=None):
    """flow_preds: list of (B, C, H, W); flow_gt: (B, C, H, W); valid: (B, 1, H, W)."""
    assert max_flow >= 0.0, "max_flow must be non-negative (mag**2 < max_flow**2 trick)"
    n_pred = len(flow_preds)
    B, C, H, W = flow_gt.shape
    Cv = valid.shape[1]
    denom = float(B * C * H * W)

    # gamma^(N-1-i) / denom baked into the kernel as compile-time constants.
    weights = tuple(float(gamma ** (n_pred - i - 1)) / denom for i in range(n_pred))
    max_flow_sq = float(max_flow) * float(max_flow)

    flow_isz = jnp.dtype(flow_gt.dtype).itemsize
    valid_isz = jnp.dtype(valid.dtype).itemsize
    sublane_mult = max(
        _sublane_multiple(flow_gt.dtype),
        _sublane_multiple(valid.dtype),
        *[_sublane_multiple(p.dtype) for p in flow_preds])

    # VMEM bytes per H-row: double-buffered input blocks + in-kernel f32 temps
    # (upcast gt tile, |diff| tile, mask / mag_sq / channel-sum planes).
    bytes_per_row = (
        2 * ((n_pred + 1) * B * C * W * flow_isz + B * Cv * W * valid_isz)
        + 2 * B * C * W * 4
        + 3 * B * Cv * W * 4
    )
    budget, vmem_limit = _vmem_sizes()
    tile_h = _select_tile_h(H, sublane_mult, bytes_per_row, budget, tile_h)
    num_tiles = pl.cdiv(H, tile_h)

    kernel = functools.partial(
        _seq_loss_kernel,
        weights=weights, max_flow_sq=max_flow_sq, h_total=H, tile_h=tile_h,
    )

    flow_spec = pl.BlockSpec((B, C, tile_h, W), lambda t: (0, 0, t, 0))
    valid_spec = pl.BlockSpec((B, Cv, tile_h, W), lambda t: (0, 0, t, 0))

    bytes_accessed = ((n_pred + 1) * B * C * H * W * flow_isz
                      + B * Cv * H * W * valid_isz
                      + num_tiles * 8 * 128 * 4)
    flops = (4 * n_pred + 6) * B * C * H * W

    partials = pl.pallas_call(
        kernel,
        out_shape=jax.ShapeDtypeStruct((num_tiles, 8, 128), jnp.float32),
        grid=(num_tiles,),
        in_specs=[flow_spec] * n_pred + [flow_spec, valid_spec],
        out_specs=pl.BlockSpec((1, 8, 128), lambda t: (t, 0, 0)),
        compiler_params=pltpu.CompilerParams(
            dimension_semantics=("parallel",),      # independent per-tile outputs
            vmem_limit_bytes=vmem_limit,
        ),
        cost_estimate=pl.CostEstimate(
            flops=flops, transcendentals=0, bytes_accessed=bytes_accessed),
    )(*flow_preds, flow_gt, valid)

    # Tiny final reduction over per-tile partials (each block is a broadcast scalar).
    return jnp.sum(partials[:, 0, 0])


def sequence_loss_ref(flow_preds, flow_gt, valid, *, gamma, max_flow):
    """Pure-JAX reference mirroring the PyTorch module (f32 math)."""
    n_pred = len(flow_preds)
    flow_gt = flow_gt.astype(jnp.float32)
    valid = valid.astype(jnp.float32)
    mag = jnp.sqrt(jnp.sum(flow_gt ** 2, axis=1, keepdims=True))
    v = jnp.logical_and(valid >= 0.5, mag < max_flow).astype(jnp.float32)
    loss = 0.0
    for i in range(n_pred):
        w = gamma ** (n_pred - i - 1)
        loss = loss + w * jnp.mean(v * jnp.abs(flow_preds[i].astype(jnp.float32) - flow_gt))
    return loss


if __name__ == "__main__":
    key = jax.random.PRNGKey(0)

    B, C, H, W = 2, 2, 20, 16      # H=20 exercises the ragged last H-tile path
    N_PRED = 6
    GAMMA = 0.8
    MAX_FLOW = 12.0                # small enough that the magnitude mask filters pixels

    k_gt, k_val, *k_preds = jax.random.split(key, 2 + N_PRED)

    # Mimic inputs dict: inputs['flows'][:, 0] and inputs['valids'][:, 0]
    flows = jax.random.normal(k_gt, (B, 1, C, H, W), dtype=jnp.float32) * 8.0
    valids = (jax.random.uniform(k_val, (B, 1, 1, H, W)) > 0.3).astype(jnp.float32)
    flow_gt = flows[:, 0]          # (B, 2, H, W)
    valid = valids[:, 0]           # (B, 1, H, W)
    flow_preds = [
        flow_gt + jax.random.normal(k, (B, C, H, W), dtype=jnp.float32) * 0.5
        for k in k_preds
    ]

    ref = jax.block_until_ready(
        sequence_loss_ref(flow_preds, flow_gt, valid, gamma=GAMMA, max_flow=MAX_FLOW))

    # 1) Auto tile selection: tile_h=16 -> 2 tiles, last tile has only 4 valid rows.
    out_auto = jax.block_until_ready(
        sequence_loss(flow_preds, flow_gt, valid, gamma=GAMMA, max_flow=MAX_FLOW))
    assert jnp.allclose(out_auto, ref, rtol=1e-4, atol=1e-6), (out_auto, ref)

    # 2) Forced tile_h=8: 3-step grid, ragged last tile (4 valid rows).
    out_t8 = jax.block_until_ready(
        sequence_loss(flow_preds, flow_gt, valid, gamma=GAMMA, max_flow=MAX_FLOW,
                      tile_h=8))
    assert jnp.allclose(out_t8, ref, rtol=1e-4, atol=1e-6), (out_t8, ref)

    # 3) Native bf16 streaming (kernel upcasts per-tile; f32 accumulate).
    preds_bf = [p.astype(jnp.bfloat16) for p in flow_preds]
    gt_bf = flow_gt.astype(jnp.bfloat16)
    val_bf = valid.astype(jnp.bfloat16)
    ref_bf = jax.block_until_ready(
        sequence_loss_ref(preds_bf, gt_bf, val_bf, gamma=GAMMA, max_flow=MAX_FLOW))
    out_bf = jax.block_until_ready(
        sequence_loss(preds_bf, gt_bf, val_bf, gamma=GAMMA, max_flow=MAX_FLOW))
    assert jnp.allclose(out_bf, ref_bf, rtol=1e-4, atol=1e-6), (out_bf, ref_bf)

    print("KERNEL_OK")
</pallas_src>

<mosaic_0001>
module attributes {stable_mosaic.version = 11 : i64} {
  func.func @_seq_loss_kernel(%arg0: i32, %arg1: memref<2x2x16x16xf32, #tpu.memory_space<vmem>>, %arg2: memref<2x2x16x16xf32, #tpu.memory_space<vmem>>, %arg3: memref<2x2x16x16xf32, #tpu.memory_space<vmem>>, %arg4: memref<2x2x16x16xf32, #tpu.memory_space<vmem>>, %arg5: memref<2x2x16x16xf32, #tpu.memory_space<vmem>>, %arg6: memref<2x2x16x16xf32, #tpu.memory_space<vmem>>, %arg7: memref<2x2x16x16xf32, #tpu.memory_space<vmem>>, %arg8: memref<2x1x16x16xf32, #tpu.memory_space<vmem>>, %arg9: memref<1x8x128xf32, #tpu.memory_space<vmem>>) attributes {dimension_semantics = [#tpu.dimension_semantics<parallel>], iteration_bounds = array<i64: 2>, scalar_prefetch = 0 : i64, scratch_operands = 0 : i64, tpu.core_type = #tpu.core_type<tc>, window_params = [{transform_indices = @transform_0, window_bounds = array<i64: 2, 2, 16, 16>}, {transform_indices = @transform_1, window_bounds = array<i64: 2, 2, 16, 16>}, {transform_indices = @transform_2, window_bounds = array<i64: 2, 2, 16, 16>}, {transform_indices = @transform_3, window_bounds = array<i64: 2, 2, 16, 16>}, {transform_indices = @transform_4, window_bounds = array<i64: 2, 2, 16, 16>}, {transform_indices = @transform_5, window_bounds = array<i64: 2, 2, 16, 16>}, {transform_indices = @transform_6, window_bounds = array<i64: 2, 2, 16, 16>}, {transform_indices = @transform_7, window_bounds = array<i64: 2, 1, 16, 16>}, {transform_indices = @transform_8, window_bounds = array<i64: 1, 8, 128>}]} {
    %c0 = arith.constant 0 : index
    %c0_0 = arith.constant 0 : index
    %c0_1 = arith.constant 0 : index
    %c0_2 = arith.constant 0 : index
    %0 = vector.load %arg7[%c0, %c0_0, %c0_1, %c0_2] : memref<2x2x16x16xf32, #tpu.memory_space<vmem>>, vector<2x2x16x16xf32>
    %c0_3 = arith.constant 0 : index
    %c0_4 = arith.constant 0 : index
    %c0_5 = arith.constant 0 : index
    %c0_6 = arith.constant 0 : index
    %1 = vector.load %arg8[%c0_3, %c0_4, %c0_5, %c0_6] : memref<2x1x16x16xf32, #tpu.memory_space<vmem>>, vector<2x1x16x16xf32>
    %2 = arith.mulf %0, %0 : vector<2x2x16x16xf32>
    %cst = arith.constant dense<0.000000e+00> : vector<2x16x16xf32>
    %3 = vector.multi_reduction <add>, %2, %cst [1] : vector<2x2x16x16xf32> to vector<2x16x16xf32>
    %4 = vector.shape_cast %3 : vector<2x16x16xf32> to vector<2x1x16x16xf32>
    %c16_i32 = arith.constant 16 : i32
    %5 = arith.muli %arg0, %c16_i32 : i32
    %c20_i32 = arith.constant 20 : i32
    %6 = arith.subi %c20_i32, %5 : i32
    %7 = tpu.iota {dimensions = array<i32: 2>} : vector<2x1x16x16xi32>
    %cst_7 = arith.constant 5.000000e-01 : f32
    %8 = vector.broadcast %cst_7 : f32 to vector<2x1x16x16xf32>
    %9 = arith.cmpf oge, %1, %8 : vector<2x1x16x16xf32>
    %cst_8 = arith.constant 1.440000e+02 : f32
    %10 = vector.broadcast %cst_8 : f32 to vector<2x1x16x16xf32>
    %11 = arith.cmpf olt, %4, %10 : vector<2x1x16x16xf32>
    %12 = arith.andi %9, %11 : vector<2x1x16x16xi1>
    %13 = vector.broadcast %6 : i32 to vector<2x1x16x16xi32>
    %14 = arith.cmpi slt, %7, %13 : vector<2x1x16x16xi32>
    %15 = arith.andi %12, %14 : vector<2x1x16x16xi1>
    %c0_9 = arith.constant 0 : index
    %c0_10 = arith.constant 0 : index
    %c0_11 = arith.constant 0 : index
    %c0_12 = arith.constant 0 : index
    %16 = vector.load %arg1[%c0_9, %c0_10, %c0_11, %c0_12] : memref<2x2x16x16xf32, #tpu.memory_space<vmem>>, vector<2x2x16x16xf32>
    %17 = arith.subf %16, %0 : vector<2x2x16x16xf32>
    %18 = math.absf %17 : vector<2x2x16x16xf32>
    %cst_13 = arith.constant dense<0.000000e+00> : vector<2x16x16xf32>
    %19 = vector.multi_reduction <add>, %18, %cst_13 [1] : vector<2x2x16x16xf32> to vector<2x16x16xf32>
    %20 = vector.shape_cast %19 : vector<2x16x16xf32> to vector<2x1x16x16xf32>
    %cst_14 = arith.constant 0.000000e+00 : f32
    %21 = vector.broadcast %cst_14 : f32 to vector<2x1x16x16xf32>
    %22 = arith.select %15, %20, %21 : vector<2x1x16x16xi1>, vector<2x1x16x16xf32>
    %23 = vector.shape_cast %22 : vector<2x1x16x16xf32> to vector<1x2x1x16x16xf32>
    %cst_15 = arith.constant dense<0.000000e+00> : vector<1xf32>
    %24 = vector.multi_reduction <add>, %23, %cst_15 [1, 2, 3, 4] : vector<1x2x1x16x16xf32> to vector<1xf32>
    %25 = vector.shape_cast %24 : vector<1xf32> to vector<1x1x1x1x1xf32>
    %26 = vector.extract %25[0, 0, 0, 0, 0] : f32 from vector<1x1x1x1x1xf32>
    %cst_16 = arith.constant 2.560000e-04 : f32
    %27 = arith.mulf %cst_16, %26 : f32
    %cst_17 = arith.constant 0.000000e+00 : f32
    %28 = arith.addf %cst_17, %27 : f32
    %c0_18 = arith.constant 0 : index
    %c0_19 = arith.constant 0 : index
    %c0_20 = arith.constant 0 : index
    %c0_21 = arith.constant 0 : index
    %29 = vector.load %arg2[%c0_18, %c0_19, %c0_20, %c0_21] : memref<2x2x16x16xf32, #tpu.memory_space<vmem>>, vector<2x2x16x16xf32>
    %30 = arith.subf %29, %0 : vector<2x2x16x16xf32>
    %31 = math.absf %30 : vector<2x2x16x16xf32>
    %cst_22 = arith.constant dense<0.000000e+00> : vector<2x16x16xf32>
    %32 = vector.multi_reduction <add>, %31, %cst_22 [1] : vector<2x2x16x16xf32> to vector<2x16x16xf32>
    %33 = vector.shape_cast %32 : vector<2x16x16xf32> to vector<2x1x16x16xf32>
    %cst_23 = arith.constant 0.000000e+00 : f32
    %34 = vector.broadcast %cst_23 : f32 to vector<2x1x16x16xf32>
    %35 = arith.select %15, %33, %34 : vector<2x1x16x16xi1>, vector<2x1x16x16xf32>
    %36 = vector.shape_cast %35 : vector<2x1x16x16xf32> to vector<1x2x1x16x16xf32>
    %cst_24 = arith.constant dense<0.000000e+00> : vector<1xf32>
    %37 = vector.multi_reduction <add>, %36, %cst_24 [1, 2, 3, 4] : vector<1x2x1x16x16xf32> to vector<1xf32>
    %38 = vector.shape_cast %37 : vector<1xf32> to vector<1x1x1x1x1xf32>
    %39 = vector.extract %38[0, 0, 0, 0, 0] : f32 from vector<1x1x1x1x1xf32>
    %cst_25 = arith.constant 3.200000e-04 : f32
    %40 = arith.mulf %cst_25, %39 : f32
    %41 = arith.addf %28, %40 : f32
    %c0_26 = arith.constant 0 : index
    %c0_27 = arith.constant 0 : index
    %c0_28 = arith.constant 0 : index
    %c0_29 = arith.constant 0 : index
    %42 = vector.load %arg3[%c0_26, %c0_27, %c0_28, %c0_29] : memref<2x2x16x16xf32, #tpu.memory_space<vmem>>, vector<2x2x16x16xf32>
    %43 = arith.subf %42, %0 : vector<2x2x16x16xf32>
    %44 = math.absf %43 : vector<2x2x16x16xf32>
    %cst_30 = arith.constant dense<0.000000e+00> : vector<2x16x16xf32>
    %45 = vector.multi_reduction <add>, %44, %cst_30 [1] : vector<2x2x16x16xf32> to vector<2x16x16xf32>
    %46 = vector.shape_cast %45 : vector<2x16x16xf32> to vector<2x1x16x16xf32>
    %cst_31 = arith.constant 0.000000e+00 : f32
    %47 = vector.broadcast %cst_31 : f32 to vector<2x1x16x16xf32>
    %48 = arith.select %15, %46, %47 : vector<2x1x16x16xi1>, vector<2x1x16x16xf32>
    %49 = vector.shape_cast %48 : vector<2x1x16x16xf32> to vector<1x2x1x16x16xf32>
    %cst_32 = arith.constant dense<0.000000e+00> : vector<1xf32>
    %50 = vector.multi_reduction <add>, %49, %cst_32 [1, 2, 3, 4] : vector<1x2x1x16x16xf32> to vector<1xf32>
    %51 = vector.shape_cast %50 : vector<1xf32> to vector<1x1x1x1x1xf32>
    %52 = vector.extract %51[0, 0, 0, 0, 0] : f32 from vector<1x1x1x1x1xf32>
    %cst_33 = arith.constant 4.000000e-04 : f32
    %53 = arith.mulf %cst_33, %52 : f32
    %54 = arith.addf %41, %53 : f32
    %c0_34 = arith.constant 0 : index
    %c0_35 = arith.constant 0 : index
    %c0_36 = arith.constant 0 : index
    %c0_37 = arith.constant 0 : index
    %55 = vector.load %arg4[%c0_34, %c0_35, %c0_36, %c0_37] : memref<2x2x16x16xf32, #tpu.memory_space<vmem>>, vector<2x2x16x16xf32>
    %56 = arith.subf %55, %0 : vector<2x2x16x16xf32>
    %57 = math.absf %56 : vector<2x2x16x16xf32>
    %cst_38 = arith.constant dense<0.000000e+00> : vector<2x16x16xf32>
    %58 = vector.multi_reduction <add>, %57, %cst_38 [1] : vector<2x2x16x16xf32> to vector<2x16x16xf32>
    %59 = vector.shape_cast %58 : vector<2x16x16xf32> to vector<2x1x16x16xf32>
    %cst_39 = arith.constant 0.000000e+00 : f32
    %60 = vector.broadcast %cst_39 : f32 to vector<2x1x16x16xf32>
    %61 = arith.select %15, %59, %60 : vector<2x1x16x16xi1>, vector<2x1x16x16xf32>
    %62 = vector.shape_cast %61 : vector<2x1x16x16xf32> to vector<1x2x1x16x16xf32>
    %cst_40 = arith.constant dense<0.000000e+00> : vector<1xf32>
    %63 = vector.multi_reduction <add>, %62, %cst_40 [1, 2, 3, 4] : vector<1x2x1x16x16xf32> to vector<1xf32>
    %64 = vector.shape_cast %63 : vector<1xf32> to vector<1x1x1x1x1xf32>
    %65 = vector.extract %64[0, 0, 0, 0, 0] : f32 from vector<1x1x1x1x1xf32>
    %cst_41 = arith.constant 5.000000e-04 : f32
    %66 = arith.mulf %cst_41, %65 : f32
    %67 = arith.addf %54, %66 : f32
    %c0_42 = arith.constant 0 : index
    %c0_43 = arith.constant 0 : index
    %c0_44 = arith.constant 0 : index
    %c0_45 = arith.constant 0 : index
    %68 = vector.load %arg5[%c0_42, %c0_43, %c0_44, %c0_45] : memref<2x2x16x16xf32, #tpu.memory_space<vmem>>, vector<2x2x16x16xf32>
    %69 = arith.subf %68, %0 : vector<2x2x16x16xf32>
    %70 = math.absf %69 : vector<2x2x16x16xf32>
    %cst_46 = arith.constant dense<0.000000e+00> : vector<2x16x16xf32>
    %71 = vector.multi_reduction <add>, %70, %cst_46 [1] : vector<2x2x16x16xf32> to vector<2x16x16xf32>
    %72 = vector.shape_cast %71 : vector<2x16x16xf32> to vector<2x1x16x16xf32>
    %cst_47 = arith.constant 0.000000e+00 : f32
    %73 = vector.broadcast %cst_47 : f32 to vector<2x1x16x16xf32>
    %74 = arith.select %15, %72, %73 : vector<2x1x16x16xi1>, vector<2x1x16x16xf32>
    %75 = vector.shape_cast %74 : vector<2x1x16x16xf32> to vector<1x2x1x16x16xf32>
    %cst_48 = arith.constant dense<0.000000e+00> : vector<1xf32>
    %76 = vector.multi_reduction <add>, %75, %cst_48 [1, 2, 3, 4] : vector<1x2x1x16x16xf32> to vector<1xf32>
    %77 = vector.shape_cast %76 : vector<1xf32> to vector<1x1x1x1x1xf32>
    %78 = vector.extract %77[0, 0, 0, 0, 0] : f32 from vector<1x1x1x1x1xf32>
    %cst_49 = arith.constant 6.250000e-04 : f32
    %79 = arith.mulf %cst_49, %78 : f32
    %80 = arith.addf %67, %79 : f32
    %c0_50 = arith.constant 0 : index
    %c0_51 = arith.constant 0 : index
    %c0_52 = arith.constant 0 : index
    %c0_53 = arith.constant 0 : index
    %81 = vector.load %arg6[%c0_50, %c0_51, %c0_52, %c0_53] : memref<2x2x16x16xf32, #tpu.memory_space<vmem>>, vector<2x2x16x16xf32>
    %82 = arith.subf %81, %0 : vector<2x2x16x16xf32>
    %83 = math.absf %82 : vector<2x2x16x16xf32>
    %cst_54 = arith.constant dense<0.000000e+00> : vector<2x16x16xf32>
    %84 = vector.multi_reduction <add>, %83, %cst_54 [1] : vector<2x2x16x16xf32> to vector<2x16x16xf32>
    %85 = vector.shape_cast %84 : vector<2x16x16xf32> to vector<2x1x16x16xf32>
    %cst_55 = arith.constant 0.000000e+00 : f32
    %86 = vector.broadcast %cst_55 : f32 to vector<2x1x16x16xf32>
    %87 = arith.select %15, %85, %86 : vector<2x1x16x16xi1>, vector<2x1x16x16xf32>
    %88 = vector.shape_cast %87 : vector<2x1x16x16xf32> to vector<1x2x1x16x16xf32>
    %cst_56 = arith.constant dense<0.000000e+00> : vector<1xf32>
    %89 = vector.multi_reduction <add>, %88, %cst_56 [1, 2, 3, 4] : vector<1x2x1x16x16xf32> to vector<1xf32>
    %90 = vector.shape_cast %89 : vector<1xf32> to vector<1x1x1x1x1xf32>
    %91 = vector.extract %90[0, 0, 0, 0, 0] : f32 from vector<1x1x1x1x1xf32>
    %cst_57 = arith.constant 7.812500e-04 : f32
    %92 = arith.mulf %cst_57, %91 : f32
    %93 = arith.addf %80, %92 : f32
    %94 = vector.broadcast %93 : f32 to vector<1x8x128xf32>
    %c0_58 = arith.constant 0 : index
    %c0_59 = arith.constant 0 : index
    %c0_60 = arith.constant 0 : index
    %95 = vector.load %arg9[%c0_58, %c0_59, %c0_60] : memref<1x8x128xf32, #tpu.memory_space<vmem>>, vector<1x8x128xf32>
    tpu.vector_store %arg9[%c0_58, %c0_59, %c0_60], %94 {strides = array<i32>} : memref<1x8x128xf32, #tpu.memory_space<vmem>>, vector<1x8x128xf32>,
    return
  }
  func.func @transform_0(%arg0: i32) -> (i32, i32, i32, i32) {
    %c0_i32 = arith.constant 0 : i32
    %c0_i32_0 = arith.constant 0 : i32
    %c0_i32_1 = arith.constant 0 : i32
    %c0_i32_2 = arith.constant 0 : i32
    return %c0_i32, %c0_i32_0, %arg0, %c0_i32_1 : i32, i32, i32, i32
  }
  func.func @transform_1(%arg0: i32) -> (i32, i32, i32, i32) {
    %c0_i32 = arith.constant 0 : i32
    %c0_i32_0 = arith.constant 0 : i32
    %c0_i32_1 = arith.constant 0 : i32
    %c0_i32_2 = arith.constant 0 : i32
    return %c0_i32, %c0_i32_0, %arg0, %c0_i32_1 : i32, i32, i32, i32
  }
  func.func @transform_2(%arg0: i32) -> (i32, i32, i32, i32) {
    %c0_i32 = arith.constant 0 : i32
    %c0_i32_0 = arith.constant 0 : i32
    %c0_i32_1 = arith.constant 0 : i32
    %c0_i32_2 = arith.constant 0 : i32
    return %c0_i32, %c0_i32_0, %arg0, %c0_i32_1 : i32, i32, i32, i32
  }
  func.func @transform_3(%arg0: i32) -> (i32, i32, i32, i32) {
    %c0_i32 = arith.constant 0 : i32
    %c0_i32_0 = arith.constant 0 : i32
    %c0_i32_1 = arith.constant 0 : i32
    %c0_i32_2 = arith.constant 0 : i32
    return %c0_i32, %c0_i32_0, %arg0, %c0_i32_1 : i32, i32, i32, i32
  }
  func.func @transform_4(%arg0: i32) -> (i32, i32, i32, i32) {
    %c0_i32 = arith.constant 0 : i32
    %c0_i32_0 = arith.constant 0 : i32
    %c0_i32_1 = arith.constant 0 : i32
    %c0_i32_2 = arith.constant 0 : i32
    return %c0_i32, %c0_i32_0, %arg0, %c0_i32_1 : i32, i32, i32, i32
  }
  func.func @transform_5(%arg0: i32) -> (i32, i32, i32, i32) {
    %c0_i32 = arith.constant 0 : i32
    %c0_i32_0 = arith.constant 0 : i32
    %c0_i32_1 = arith.constant 0 : i32
    %c0_i32_2 = arith.constant 0 : i32
    return %c0_i32, %c0_i32_0, %arg0, %c0_i32_1 : i32, i32, i32, i32
  }
  func.func @transform_6(%arg0: i32) -> (i32, i32, i32, i32) {
    %c0_i32 = arith.constant 0 : i32
    %c0_i32_0 = arith.constant 0 : i32
    %c0_i32_1 = arith.constant 0 : i32
    %c0_i32_2 = arith.constant 0 : i32
    return %c0_i32, %c0_i32_0, %arg0, %c0_i32_1 : i32, i32, i32, i32
  }
  func.func @transform_7(%arg0: i32) -> (i32, i32, i32, i32) {
    %c0_i32 = arith.constant 0 : i32
    %c0_i32_0 = arith.constant 0 : i32
    %c0_i32_1 = arith.constant 0 : i32
    %c0_i32_2 = arith.constant 0 : i32
    return %c0_i32, %c0_i32_0, %arg0, %c0_i32_1 : i32, i32, i32, i32
  }
  func.func @transform_8(%arg0: i32) -> (i32, i32, i32) {
    %c0_i32 = arith.constant 0 : i32
    %c0_i32_0 = arith.constant 0 : i32
    %c0_i32_1 = arith.constant 0 : i32
    return %arg0, %c0_i32, %c0_i32_0 : i32, i32, i32
  }
}

</mosaic_0001>

<bundles_post_ra>
// kernel: tpu_custom_call.1
= control target key start
LH: loop header
LB: loop body
LE: loop exit
PB: predicated region body
PF: predicated region fallthrough
CT: control target
= control target key end

     0   :  { %s4993_s0 = inlined_call_operand.vmem [shape: f32[2,2,20,16], index: 0, kind: input, shape index: {}]   ;;  %s4994_s1 = inlined_call_operand.vmem [shape: f32[2,2,20,16], index: 1, kind: input, shape index: {}]   ;;  %s4995_s2 = inlined_call_operand.vmem [shape: f32[2,2,20,16], index: 2, kind: input, shape index: {}]   ;;  %s4996_s3 = inlined_call_operand.vmem [shape: f32[2,2,20,16], index: 3, kind: input, shape index: {}]   ;;  %s4997_s4 = inlined_call_operand.vmem [shape: f32[2,2,20,16], index: 4, kind: input, shape index: {}]   ;;  %s4998_s5 = inlined_call_operand.vmem [shape: f32[2,2,20,16], index: 5, kind: input, shape index: {}]   ;;  %s4999_s6 = inlined_call_operand.vmem [shape: f32[2,2,20,16], index: 6, kind: input, shape index: {}]   ;;  %s5000_s7 = inlined_call_operand.vmem [shape: f32[2,1,20,16], index: 7, kind: input, shape index: {}]   ;;  %s5001_s8 = inlined_call_operand.hbm [shape: f32[2,8,128], index: 8, kind: output, shape index: {}]  }
   0x1   :  { %5002 = sst [smem:[#allocation14_spill]] %s4993_s0 }
   0x2   :  { %5003 = sst [smem:[#allocation15_spill]] %s4994_s1 }
   0x3   :  { %5004 = sst [smem:[#allocation16_spill]] %s4995_s2 }
   0x4   :  { %5005 = sst [smem:[#allocation17_spill]] %s4996_s3 }
   0x5   :  { %5006 = sst [smem:[#allocation18_spill]] %s4997_s4 }
   0x6   :  { %5007 = sst [smem:[#allocation19_spill]] %s4998_s5 }
   0x7   :  { %5008 = sst [smem:[#allocation20_spill]] %s4999_s6 }
   0x8   :  { %5009 = sst [smem:[#allocation21_spill]] %s5000_s7 }
   0x9   :  { %13 = vsyncpa [#allocation11], 0 }
   0xa   :  { %15 = vsyncpa [#allocation11 + $0x1], 0  ;;  %s3995_s27 = smov 0   ;;  %s3997_s28 = smov 0  }
   0xb   :  { %s3999_s29 = smov 0   ;;  %s4001_s30 = smov 0  }
   0xc LB: > { %s4016_s9 = sadd.s32 4294967295, %s3691_s30   ;;  %s2648_s10 = sadd.s32 4294967294, %s3691_s30   ;;  %s3691_s30 = sphi %s4001_s30, %s5084_s30   ;;  %s3687_s29 = sphi %s3999_s29, %s5083_s29   ;;  %s3683_s28 = sphi %s3997_s28, %s5082_s28   ;;  %s3679_s27 = sphi %s3995_s27, %s5081_s27  }
   0xd   : > { %s4020_s11 = sadd.s32 1, %s3691_s30   ;;  %s28_s12 = sadd.s32 1, %s3687_s29 }
   0xe   : > { %s25_s13 = ssub.s32 %s3691_s30, %s4020_s11  ;;  %p35_p0 = scmp.ne.s32.totalorder %s3687_s29, %s3683_s28 }
   0xf   : > { %p26_p1 = scmp.eq.s32.totalorder %s25_s13, 0  ;;  %p36_p2 = scmp.eq.s32.totalorder %s3691_s30, 0 }
  0x10   : > { %p247_p3 = scmp.eq.s32.totalorder %s4016_s9, 1  ;;  %p252_p4 = scmp.ne.s32.totalorder %s3683_s28, %s3679_s27 }
  0x11   : > { %s4032_s14 = scalar_select %p26_p1, %s3687_s29, %s28_s12  }
  0x12   : > { %p4034_p5 = por %p36_p2, %p35_p0  ;;  %p4038_p6 = por %p247_p3, %p35_p0 }
  0x13   : > { %5010 = sst [smem:[#allocation13_spill]] %s4032_s14  ;;  %p253_p7 = scmp.eq.s32.totalorder %s2648_s10, 1 }
  0x14   : > { %p2650_p9 = scmp.ge.s32.totalorder %s3691_s30, 2 }
  0x15   : > { %p4042_p8 = por %p253_p7, %p252_p4 }
  0x16   : > { %269 = sbr.rel (%p2650_p9) target bundleno = 477 (0x1dd), region = 16 }
  0x1d   : > { %272 = sbr.rel (!%p4034_p5) target bundleno = 85 (0x55), region = 20  ;;  %s274_s18 = sand.u32 (%p4034_p5), 1, %s3687_s29  }
  0x1e   : > { %s2652_s19 = sshll.u32 (%p4034_p5), %s3691_s30, 1  ;;  %s2651_s20 = sshll.u32 (%p4034_p5), %s274_s18, 6 }
  0x1f   : > { %s278_s21 = ssub.s32 (%p4034_p5), 3, %s2652_s19  ;;  %s2786_s22 = sshll.u32 (%p4034_p5), %s3691_s30, 4 }
  0x20   : > { %p279_p10 = scmp.lt.s32.totalorder (%p4034_p5), %s278_s21, 2  ;;  %s5014_s0 = sld [smem:[#allocation14_spill]] (%p4034_p5) }
  0x21   : > { %s4062_s10 = scalar_lea.vmem (%p4034_p5), [#allocation2], %s2651_s20  }
  0x24   : > { %s5086_s21 = smov (!%p279_p10, %s278_s21), 2 }
  0x25   : > { %s2653_s26 = sshll.u32 %s5086_s21, 9 }
  0x26   : > { %s4059_s25 = scalar_lea.vmem %s5014_s0, %s2786_s22   ;;  %p2656_p11 = scmp.eq.s32.totalorder %s2653_s26, 0 }
  0x27   : > { %s4065_s12 = sshrl.u32 (!%p2656_p11), %s5086_s21, 1 }
  0x28   : > { %287 = sbr.rel (%p2656_p11) target bundleno = 85 (0x55), region = 24  ;;  %p2657_p12 = scmp.le.s32.totalorder (!%p2656_p11), %s4065_s12, 0 }
  0x2f   : > { %2366 = sbr.rel (%p2657_p12) target bundleno = 64 (0x40), region = 622  ;;  %s5015_s13 = smov (!%p2657_p12), %s4062_s10 }
  0x30   : > { %s5016_s18 = smov (!%p2657_p12), %s4059_s25  ;;  %s4074_s19 = smov (!%p2657_p12), 0  }
  0x31   : > { %s4076_s22 = smov (!%p2657_p12), 0  }
  0x36 LB: >> { %v369_v0 = vld [vmem:[%s3699_s18] sm:$0xff]  ;;  %v371_v1 = vld [vmem:[%s3699_s18 + $0x8] sm:$0xff]  ;;  %v373_v2 = vld [vmem:[%s3699_s18 + $0x18] sm:$0xff]  ;;  %s385_s20 = sadd.s32 1, %s3703_s19  ;;  %s363_s22 = sadd.s32 1, %s3707_s22   ;;  %s3707_s22 = sphi %s4076_s22, %s363_s22   ;;  %s3703_s19 = sphi %s4074_s19, %s5017_s19   ;;  %s3699_s18 = sphi %s5016_s18, %s390_s18   ;;  %s3695_s13 = sphi %s5015_s13, %s391_s13  }
  0x37   : >> { %370 = vst [vmem:[%s3695_s13] sm:$0xff] %v369_v0  ;;  %372 = vst [vmem:[%s3695_s13 + $0x8] sm:$0xff] %v371_v1  ;;  %v375_v3 = vld [vmem:[%s3699_s18 + $0x20] sm:$0xff]  ;;  %v377_v4 = vld [vmem:[%s3699_s18 + $0x30] sm:$0xff]  ;;  %p386_p13 = scmp.ge.s32.totalorder %s385_s20, %s4065_s12  ;;  %p362_p0 = scmp.ge.s32.totalorder %s363_s22, %s4065_s12 }
  0x38   : >> { %374 = vst [vmem:[%s3695_s13 + $0x10] sm:$0xff] %v373_v2  ;;  %v379_v5 = vld [vmem:[%s3699_s18 + $0x38] sm:$0xff]  ;;  %376 = vst [vmem:[%s3695_s13 + $0x18] sm:$0xff] %v375_v3  ;;  %v381_v6 = vld [vmem:[%s3699_s18 + $0x48] sm:$0xff] }
  0x39   : >> { %378 = vst [vmem:[%s3695_s13 + $0x20] sm:$0xff] %v377_v4  ;;  %380 = vst [vmem:[%s3695_s13 + $0x28] sm:$0xff] %v379_v5  ;;  %v383_v7 = vld [vmem:[%s3699_s18 + $0x50] sm:$0xff]  ;;  %s5088_s20 = smov (%p386_p13, %s385_s20), 0  ;;  %365 = sbr.rel (!%p362_p0) target bundleno = 54 (0x36), region = 628 }
  0x3a   : >> { %382 = vst [vmem:[%s3695_s13 + $0x30] sm:$0xff] %v381_v6  ;;  %384 = vst [vmem:[%s3695_s13 + $0x38] sm:$0xff] %v383_v7  ;;  %s2658_s23 = sshll.u32 %s5088_s20, 4  ;;  %s5017_s19 = smov %s5088_s20 }
  0x3b   : >> { %s390_s18 = scalar_lea.vmem %s4059_s25, %s2658_s23   ;;  %s391_s13 = scalar_lea.vmem %s4062_s10, %s2658_s23 [#allocation2]  }
  0x40 PF: > { %s4095_s24 = sand.u32 1, %s5086_s21   ;;  %s2787_s26 = sshll.u32 %s4065_s12, 4 }
  0x41   : > { %s4099_s23 = scalar_lea.vmem %s4059_s25, %s2787_s26   ;;  %s4102_s0 = scalar_lea.vmem %s4062_s10, %s2787_s26 [#allocation2]  }
  0x42   : > { %p2663_p1 = scmp.le.s32.totalorder %s4095_s24, 0 }
  0x43   : > { %s5018_s22 = smov (!%p2663_p1), %s4102_s0  ;;  %s5019_s13 = smov (!%p2663_p1), %s4099_s23 }
  0x44   : > { %2380 = sbr.rel (%p2663_p1) target bundleno = 85 (0x55), region = 633  ;;  %s3717_s18 = smov (!%p2663_p1), 0  }
  0x45   : > { %s3721_s19 = smov (!%p2663_p1), 0  }
  0x4b LB: >> { %v408_v8 = vld [vmem:[%s3715_s13] sm:$0xff]  ;;  %v410_v9 = vld [vmem:[%s3715_s13 + $0x18] sm:$0xff]  ;;  %v412_v10 = vld [vmem:[%s3715_s13 + $0x30] sm:$0xff]  ;;  %s416_s21 = sadd.s32 1, %s3719_s18  ;;  %s402_s19 = sadd.s32 1, %s3723_s19   ;;  %s3723_s19 = sphi %s3721_s19, %s402_s19   ;;  %s3719_s18 = sphi %s3717_s18, %s3718_s18   ;;  %s3715_s13 = sphi %s5019_s13, %s421_s13   ;;  %s3711_s22 = sphi %s5018_s22, %s422_s22  }
  0x4c   : >> { %409 = vst [vmem:[%s3711_s22] sm:$0xff] %v408_v8  ;;  %411 = vst [vmem:[%s3711_s22 + $0x10] sm:$0xff] %v410_v9  ;;  %v414_v11 = vld [vmem:[%s3715_s13 + $0x48] sm:$0xff]  ;;  %p417_p2 = scmp.ge.s32.totalorder %s416_s21, %s4095_s24  ;;  %p401_p3 = scmp.ge.s32.totalorder %s402_s19, %s4095_s24 }
  0x4d   : >> { %413 = vst [vmem:[%s3711_s22 + $0x20] sm:$0xff] %v412_v10  ;;  %415 = vst [vmem:[%s3711_s22 + $0x30] sm:$0xff] %v414_v11 }
  0x4e   : >> { %s5090_s21 = smov (%p417_p2, %s416_s21), 0  ;;  %404 = sbr.rel (!%p401_p3) target bundleno = 75 (0x4b), region = 639 }
  0x4f   : >> { %s2664_s25 = sshll.u32 %s5090_s21, 3  ;;  %s3718_s18 = smov %s5090_s21  }
  0x50   : >> { %s421_s13 = scalar_lea.vmem %s4099_s23, %s2664_s25   ;;  %s422_s22 = scalar_lea.vmem %s4102_s0, %s2664_s25 [#allocation2]  }
  0x55 PF: > { %428 = sbr.rel (!%p4034_p5) target bundleno = 141 (0x8d), region = 72  ;;  %s430_s10 = sand.u32 (%p4034_p5), 1, %s3687_s29  }
  0x56   : > { %s2667_s12 = sshll.u32 (%p4034_p5), %s3691_s30, 1  ;;  %s2666_s20 = sshll.u32 (%p4034_p5), %s430_s10, 6 }
  0x57   : > { %s434_s26 = ssub.s32 (%p4034_p5), 3, %s2667_s12  ;;  %s2789_s18 = sshll.u32 (%p4034_p5), %s3691_s30, 4 }
  0x58   : > { %p435_p4 = scmp.lt.s32.totalorder (%p4034_p5), %s434_s26, 2  ;;  %s5020_s1 = sld [smem:[#allocation15_spill]] (%p4034_p5) }
  0x59   : > { %s4134_s23 = scalar_lea.vmem (%p4034_p5), [#allocation3], %s2666_s20  }
  0x5c   : > { %s5092_s26 = smov (!%p435_p4, %s434_s26), 2 }
  0x5d   : > { %s2668_s24 = sshll.u32 %s5092_s26, 9 }
  0x5e   : > { %s4131_s0 = scalar_lea.vmem %s5020_s1, %s2789_s18   ;;  %p2671_p7 = scmp.eq.s32.totalorder %s2668_s24, 0 }
  0x5f   : > { %s4137_s22 = sshrl.u32 (!%p2671_p7), %s5092_s26, 1 }
  0x60   : > { %443 = sbr.rel (%p2671_p7) target bundleno = 141 (0x8d), region = 76  ;;  %p2672_p10 = scmp.le.s32.totalorder (!%p2671_p7), %s4137_s22, 0 }
  0x67   : > { %2394 = sbr.rel (%p2672_p10) target bundleno = 120 (0x78), region = 644  ;;  %s5021_s21 = smov (!%p2672_p10), %s4134_s23 }
  0x68   : > { %s5022_s25 = smov (!%p2672_p10), %s4131_s0  ;;  %s4146_s10 = smov (!%p2672_p10), 0  }
  0x69   : > { %s4148_s12 = smov (!%p2672_p10), 0  }
  0x6e LB: >> { %v525_v12 = vld [vmem:[%s3731_s25] sm:$0xff]  ;;  %v527_v13 = vld [vmem:[%s3731_s25 + $0x8] sm:$0xff]  ;;  %v529_v14 = vld [vmem:[%s3731_s25 + $0x18] sm:$0xff]  ;;  %s541_s20 = sadd.s32 1, %s3735_s10  ;;  %s519_s12 = sadd.s32 1, %s3739_s12   ;;  %s3739_s12 = sphi %s4148_s12, %s519_s12   ;;  %s3735_s10 = sphi %s4146_s10, %s5023_s10   ;;  %s3731_s25 = sphi %s5022_s25, %s546_s25   ;;  %s3727_s21 = sphi %s5021_s21, %s547_s21  }
  0x6f   : >> { %526 = vst [vmem:[%s3727_s21] sm:$0xff] %v525_v12  ;;  %528 = vst [vmem:[%s3727_s21 + $0x8] sm:$0xff] %v527_v13  ;;  %v531_v15 = vld [vmem:[%s3731_s25 + $0x20] sm:$0xff]  ;;  %v533_v16 = vld [vmem:[%s3731_s25 + $0x30] sm:$0xff]  ;;  %p542_p11 = scmp.ge.s32.totalorder %s541_s20, %s4137_s22  ;;  %p518_p12 = scmp.ge.s32.totalorder %s519_s12, %s4137_s22 }
  0x70   : >> { %530 = vst [vmem:[%s3727_s21 + $0x10] sm:$0xff] %v529_v14  ;;  %v535_v17 = vld [vmem:[%s3731_s25 + $0x38] sm:$0xff]  ;;  %532 = vst [vmem:[%s3727_s21 + $0x18] sm:$0xff] %v531_v15  ;;  %v537_v18 = vld [vmem:[%s3731_s25 + $0x48] sm:$0xff] }
  0x71   : >> { %534 = vst [vmem:[%s3727_s21 + $0x20] sm:$0xff] %v533_v16  ;;  %536 = vst [vmem:[%s3727_s21 + $0x28] sm:$0xff] %v535_v17  ;;  %v539_v19 = vld [vmem:[%s3731_s25 + $0x50] sm:$0xff]  ;;  %s5094_s20 = smov (%p542_p11, %s541_s20), 0  ;;  %521 = sbr.rel (!%p518_p12) target bundleno = 110 (0x6e), region = 650 }
  0x72   : >> { %538 = vst [vmem:[%s3727_s21 + $0x30] sm:$0xff] %v537_v18  ;;  %540 = vst [vmem:[%s3727_s21 + $0x38] sm:$0xff] %v539_v19  ;;  %s2673_s18 = sshll.u32 %s5094_s20, 4  ;;  %s5023_s10 = smov %s5094_s20 }
  0x73   : >> { %s546_s25 = scalar_lea.vmem %s4131_s0, %s2673_s18   ;;  %s547_s21 = scalar_lea.vmem %s4134_s23, %s2673_s18 [#allocation3]  }
  0x78 PF: > { %s4167_s13 = sand.u32 1, %s5092_s26   ;;  %s2790_s19 = sshll.u32 %s4137_s22, 4 }
  0x79   : > { %s4171_s24 = scalar_lea.vmem %s4131_s0, %s2790_s19   ;;  %s4174_s18 = scalar_lea.vmem %s4134_s23, %s2790_s19 [#allocation3]  }
  0x7a   : > { %p2678_p13 = scmp.le.s32.totalorder %s4167_s13, 0 }
  0x7b   : > { %s5024_s12 = smov (!%p2678_p13), %s4174_s18  ;;  %s5025_s21 = smov (!%p2678_p13), %s4171_s24 }
  0x7c   : > { %2408 = sbr.rel (%p2678_p13) target bundleno = 141 (0x8d), region = 655  ;;  %s3749_s25 = smov (!%p2678_p13), 0  }
  0x7d   : > { %s3753_s10 = smov (!%p2678_p13), 0  }
  0x83 LB: >> { %v564_v20 = vld [vmem:[%s3747_s21] sm:$0xff]  ;;  %v566_v21 = vld [vmem:[%s3747_s21 + $0x18] sm:$0xff]  ;;  %v568_v22 = vld [vmem:[%s3747_s21 + $0x30] sm:$0xff]  ;;  %s572_s26 = sadd.s32 1, %s3751_s25  ;;  %s558_s10 = sadd.s32 1, %s3755_s10   ;;  %s3755_s10 = sphi %s3753_s10, %s558_s10   ;;  %s3751_s25 = sphi %s3749_s25, %s3750_s25   ;;  %s3747_s21 = sphi %s5025_s21, %s577_s21   ;;  %s3743_s12 = sphi %s5024_s12, %s578_s12  }
  0x84   : >> { %565 = vst [vmem:[%s3743_s12] sm:$0xff] %v564_v20  ;;  %567 = vst [vmem:[%s3743_s12 + $0x10] sm:$0xff] %v566_v21  ;;  %v570_v23 = vld [vmem:[%s3747_s21 + $0x48] sm:$0xff]  ;;  %p573_p0 = scmp.ge.s32.totalorder %s572_s26, %s4167_s13  ;;  %p557_p1 = scmp.ge.s32.totalorder %s558_s10, %s4167_s13 }
  0x85   : >> { %569 = vst [vmem:[%s3743_s12 + $0x20] sm:$0xff] %v568_v22  ;;  %571 = vst [vmem:[%s3743_s12 + $0x30] sm:$0xff] %v570_v23 }
  0x86   : >> { %s5096_s26 = smov (%p573_p0, %s572_s26), 0  ;;  %560 = sbr.rel (!%p557_p1) target bundleno = 131 (0x83), region = 661 }
  0x87   : >> { %s2679_s0 = sshll.u32 %s5096_s26, 3  ;;  %s3750_s25 = smov %s5096_s26  }
  0x88   : >> { %s577_s21 = scalar_lea.vmem %s4171_s24, %s2679_s0   ;;  %s578_s12 = scalar_lea.vmem %s4174_s18, %s2679_s0 [#allocation3]  }
  0x8d PF: > { %584 = sbr.rel (!%p4034_p5) target bundleno = 197 (0xc5), region = 124  ;;  %s586_s23 = sand.u32 (%p4034_p5), 1, %s3687_s29  }
  0x8e   : > { %s2682_s22 = sshll.u32 (%p4034_p5), %s3691_s30, 1  ;;  %s2681_s20 = sshll.u32 (%p4034_p5), %s586_s23, 6 }
  0x8f   : > { %s590_s19 = ssub.s32 (%p4034_p5), 3, %s2682_s22  ;;  %s2792_s25 = sshll.u32 (%p4034_p5), %s3691_s30, 4 }
  0x90   : > { %p591_p2 = scmp.lt.s32.totalorder (%p4034_p5), %s590_s19, 2  ;;  %s5026_s2 = sld [smem:[#allocation16_spill]] (%p4034_p5) }
  0x91   : > { %s4206_s18 = scalar_lea.vmem (%p4034_p5), [#allocation4], %s2681_s20  }
  0x94   : > { %s5098_s19 = smov (!%p591_p2, %s590_s19), 2 }
  0x95   : > { %s2683_s24 = sshll.u32 %s5098_s19, 9 }
  0x96   : > { %s4203_s13 = scalar_lea.vmem %s5026_s2, %s2792_s25   ;;  %p2686_p3 = scmp.eq.s32.totalorder %s2683_s24, 0 }
  0x97   : > { %s4209_s12 = sshrl.u32 (!%p2686_p3), %s5098_s19, 1 }
  0x98   : > { %599 = sbr.rel (%p2686_p3) target bundleno = 197 (0xc5), region = 128  ;;  %p2687_p4 = scmp.le.s32.totalorder (!%p2686_p3), %s4209_s12, 0 }
  0x9f   : > { %2422 = sbr.rel (%p2687_p4) target bundleno = 176 (0xb0), region = 666  ;;  %s5027_s26 = smov (!%p2687_p4), %s4206_s18 }
  0xa0   : > { %s5028_s0 = smov (!%p2687_p4), %s4203_s13  ;;  %s4218_s23 = smov (!%p2687_p4), 0  }
  0xa1   : > { %s4220_s22 = smov (!%p2687_p4), 0  }
  0xa6 LB: >> { %v681_v24 = vld [vmem:[%s3763_s0] sm:$0xff]  ;;  %v683_v25 = vld [vmem:[%s3763_s0 + $0x8] sm:$0xff]  ;;  %v685_v26 = vld [vmem:[%s3763_s0 + $0x18] sm:$0xff]  ;;  %s697_s20 = sadd.s32 1, %s3767_s23  ;;  %s675_s22 = sadd.s32 1, %s3771_s22   ;;  %s3771_s22 = sphi %s4220_s22, %s675_s22   ;;  %s3767_s23 = sphi %s4218_s23, %s5029_s23   ;;  %s3763_s0 = sphi %s5028_s0, %s702_s0   ;;  %s3759_s26 = sphi %s5027_s26, %s703_s26  }
  0xa7   : >> { %682 = vst [vmem:[%s3759_s26] sm:$0xff] %v681_v24  ;;  %684 = vst [vmem:[%s3759_s26 + $0x8] sm:$0xff] %v683_v25  ;;  %v687_v27 = vld [vmem:[%s3763_s0 + $0x20] sm:$0xff]  ;;  %v689_v28 = vld [vmem:[%s3763_s0 + $0x30] sm:$0xff]  ;;  %p698_p7 = scmp.ge.s32.totalorder %s697_s20, %s4209_s12  ;;  %p674_p10 = scmp.ge.s32.totalorder %s675_s22, %s4209_s12 }
  0xa8   : >> { %686 = vst [vmem:[%s3759_s26 + $0x10] sm:$0xff] %v685_v26  ;;  %v691_v29 = vld [vmem:[%s3763_s0 + $0x38] sm:$0xff]  ;;  %688 = vst [vmem:[%s3759_s26 + $0x18] sm:$0xff] %v687_v27  ;;  %v693_v30 = vld [vmem:[%s3763_s0 + $0x48] sm:$0xff] }
  0xa9   : >> { %690 = vst [vmem:[%s3759_s26 + $0x20] sm:$0xff] %v689_v28  ;;  %692 = vst [vmem:[%s3759_s26 + $0x28] sm:$0xff] %v691_v29  ;;  %v695_v31 = vld [vmem:[%s3763_s0 + $0x50] sm:$0xff]  ;;  %s5100_s20 = smov (%p698_p7, %s697_s20), 0  ;;  %677 = sbr.rel (!%p674_p10) target bundleno = 166 (0xa6), region = 672 }
  0xaa   : >> { %694 = vst [vmem:[%s3759_s26 + $0x30] sm:$0xff] %v693_v30  ;;  %696 = vst [vmem:[%s3759_s26 + $0x38] sm:$0xff] %v695_v31  ;;  %s2688_s25 = sshll.u32 %s5100_s20, 4  ;;  %s5029_s23 = smov %s5100_s20 }
  0xab   : >> { %s702_s0 = scalar_lea.vmem %s4203_s13, %s2688_s25   ;;  %s703_s26 = scalar_lea.vmem %s4206_s18, %s2688_s25 [#allocation4]  }
  0xb0 PF: > { %s4239_s21 = sand.u32 1, %s5098_s19   ;;  %s2793_s10 = sshll.u32 %s4209_s12, 4 }
  0xb1   : > { %s4243_s24 = scalar_lea.vmem %s4203_s13, %s2793_s10   ;;  %s4246_s25 = scalar_lea.vmem %s4206_s18, %s2793_s10 [#allocation4]  }
  0xb2   : > { %p2693_p11 = scmp.le.s32.totalorder %s4239_s21, 0 }
  0xb3   : > { %s5030_s22 = smov (!%p2693_p11), %s4246_s25  ;;  %s5031_s26 = smov (!%p2693_p11), %s4243_s24 }
  0xb4   : > { %2436 = sbr.rel (%p2693_p11) target bundleno = 197 (0xc5), region = 677  ;;  %s3781_s0 = smov (!%p2693_p11), 0  }
  0xb5   : > { %s3785_s23 = smov (!%p2693_p11), 0  }
  0xbb LB: >> { %v720_v32 = vld [vmem:[%s3779_s26] sm:$0xff]  ;;  %v722_v33 = vld [vmem:[%s3779_s26 + $0x18] sm:$0xff]  ;;  %v724_v34 = vld [vmem:[%s3779_s26 + $0x30] sm:$0xff]  ;;  %s728_s19 = sadd.s32 1, %s3783_s0  ;;  %s714_s23 = sadd.s32 1, %s3787_s23   ;;  %s3787_s23 = sphi %s3785_s23, %s714_s23   ;;  %s3783_s0 = sphi %s3781_s0, %s3782_s0   ;;  %s3779_s26 = sphi %s5031_s26, %s733_s26   ;;  %s3775_s22 = sphi %s5030_s22, %s734_s22  }
  0xbc   : >> { %721 = vst [vmem:[%s3775_s22] sm:$0xff] %v720_v32  ;;  %723 = vst [vmem:[%s3775_s22 + $0x10] sm:$0xff] %v722_v33  ;;  %v726_v35 = vld [vmem:[%s3779_s26 + $0x48] sm:$0xff]  ;;  %p729_p12 = scmp.ge.s32.totalorder %s728_s19, %s4239_s21  ;;  %p713_p13 = scmp.ge.s32.totalorder %s714_s23, %s4239_s21 }
  0xbd   : >> { %725 = vst [vmem:[%s3775_s22 + $0x20] sm:$0xff] %v724_v34  ;;  %727 = vst [vmem:[%s3775_s22 + $0x30] sm:$0xff] %v726_v35 }
  0xbe   : >> { %s5102_s19 = smov (%p729_p12, %s728_s19), 0  ;;  %716 = sbr.rel (!%p713_p13) target bundleno = 187 (0xbb), region = 683 }
  0xbf   : >> { %s2694_s13 = sshll.u32 %s5102_s19, 3  ;;  %s3782_s0 = smov %s5102_s19  }
  0xc0   : >> { %s733_s26 = scalar_lea.vmem %s4243_s24, %s2694_s13   ;;  %s734_s22 = scalar_lea.vmem %s4246_s25, %s2694_s13 [#allocation4]  }
  0xc5 PF: > { %740 = sbr.rel (!%p4034_p5) target bundleno = 253 (0xfd), region = 176  ;;  %s742_s18 = sand.u32 (%p4034_p5), 1, %s3687_s29  }
  0xc6   : > { %s2697_s12 = sshll.u32 (%p4034_p5), %s3691_s30, 1  ;;  %s2696_s20 = sshll.u32 (%p4034_p5), %s742_s18, 6 }
  0xc7   : > { %s746_s10 = ssub.s32 (%p4034_p5), 3, %s2697_s12  ;;  %s2795_s0 = sshll.u32 (%p4034_p5), %s3691_s30, 4 }
  0xc8   : > { %p747_p0 = scmp.lt.s32.totalorder (%p4034_p5), %s746_s10, 2  ;;  %s5032_s3 = sld [smem:[#allocation17_spill]] (%p4034_p5) }
  0xc9   : > { %s4278_s25 = scalar_lea.vmem (%p4034_p5), [#allocation5], %s2696_s20  }
  0xcc   : > { %s5104_s10 = smov (!%p747_p0, %s746_s10), 2 }
  0xcd   : > { %s2698_s24 = sshll.u32 %s5104_s10, 9 }
  0xce   : > { %s4275_s21 = scalar_lea.vmem %s5032_s3, %s2795_s0   ;;  %p2701_p1 = scmp.eq.s32.totalorder %s2698_s24, 0 }
  0xcf   : > { %s4281_s22 = sshrl.u32 (!%p2701_p1), %s5104_s10, 1 }
  0xd0   : > { %755 = sbr.rel (%p2701_p1) target bundleno = 253 (0xfd), region = 180  ;;  %p2702_p2 = scmp.le.s32.totalorder (!%p2701_p1), %s4281_s22, 0 }
  0xd7   : > { %2450 = sbr.rel (%p2702_p2) target bundleno = 232 (0xe8), region = 688  ;;  %s5033_s19 = smov (!%p2702_p2), %s4278_s25 }
  0xd8   : > { %s5034_s13 = smov (!%p2702_p2), %s4275_s21  ;;  %s4290_s18 = smov (!%p2702_p2), 0  }
  0xd9   : > { %s4292_s12 = smov (!%p2702_p2), 0  }
  0xde LB: >> { %v837_v36 = vld [vmem:[%s3795_s13] sm:$0xff]  ;;  %v839_v37 = vld [vmem:[%s3795_s13 + $0x8] sm:$0xff]  ;;  %v841_v38 = vld [vmem:[%s3795_s13 + $0x18] sm:$0xff]  ;;  %s853_s20 = sadd.s32 1, %s3799_s18  ;;  %s831_s12 = sadd.s32 1, %s3803_s12   ;;  %s3803_s12 = sphi %s4292_s12, %s831_s12   ;;  %s3799_s18 = sphi %s4290_s18, %s5035_s18   ;;  %s3795_s13 = sphi %s5034_s13, %s858_s13   ;;  %s3791_s19 = sphi %s5033_s19, %s859_s19  }
  0xdf   : >> { %838 = vst [vmem:[%s3791_s19] sm:$0xff] %v837_v36  ;;  %840 = vst [vmem:[%s3791_s19 + $0x8] sm:$0xff] %v839_v37  ;;  %v843_v39 = vld [vmem:[%s3795_s13 + $0x20] sm:$0xff]  ;;  %v845_v40 = vld [vmem:[%s3795_s13 + $0x30] sm:$0xff]  ;;  %p854_p3 = scmp.ge.s32.totalorder %s853_s20, %s4281_s22  ;;  %p830_p4 = scmp.ge.s32.totalorder %s831_s12, %s4281_s22 }
  0xe0   : >> { %842 = vst [vmem:[%s3791_s19 + $0x10] sm:$0xff] %v841_v38  ;;  %v847_v41 = vld [vmem:[%s3795_s13 + $0x38] sm:$0xff]  ;;  %844 = vst [vmem:[%s3791_s19 + $0x18] sm:$0xff] %v843_v39  ;;  %v849_v42 = vld [vmem:[%s3795_s13 + $0x48] sm:$0xff] }
  0xe1   : >> { %846 = vst [vmem:[%s3791_s19 + $0x20] sm:$0xff] %v845_v40  ;;  %848 = vst [vmem:[%s3791_s19 + $0x28] sm:$0xff] %v847_v41  ;;  %v851_v43 = vld [vmem:[%s3795_s13 + $0x50] sm:$0xff]  ;;  %s5106_s20 = smov (%p854_p3, %s853_s20), 0  ;;  %833 = sbr.rel (!%p830_p4) target bundleno = 222 (0xde), region = 694 }
  0xe2   : >> { %850 = vst [vmem:[%s3791_s19 + $0x30] sm:$0xff] %v849_v42  ;;  %852 = vst [vmem:[%s3791_s19 + $0x38] sm:$0xff] %v851_v43  ;;  %s2703_s0 = sshll.u32 %s5106_s20, 4  ;;  %s5035_s18 = smov %s5106_s20 }
  0xe3   : >> { %s858_s13 = scalar_lea.vmem %s4275_s21, %s2703_s0   ;;  %s859_s19 = scalar_lea.vmem %s4278_s25, %s2703_s0 [#allocation5]  }
  0xe8 PF: > { %s4311_s26 = sand.u32 1, %s5104_s10   ;;  %s2796_s23 = sshll.u32 %s4281_s22, 4 }
  0xe9   : > { %s4315_s24 = scalar_lea.vmem %s4275_s21, %s2796_s23   ;;  %s4318_s0 = scalar_lea.vmem %s4278_s25, %s2796_s23 [#allocation5]  }
  0xea   : > { %p2708_p7 = scmp.le.s32.totalorder %s4311_s26, 0 }
  0xeb   : > { %s5036_s12 = smov (!%p2708_p7), %s4318_s0  ;;  %s5037_s19 = smov (!%p2708_p7), %s4315_s24 }
  0xec   : > { %2464 = sbr.rel (%p2708_p7) target bundleno = 253 (0xfd), region = 699  ;;  %s3813_s13 = smov (!%p2708_p7), 0  }
  0xed   : > { %s3817_s18 = smov (!%p2708_p7), 0  }
  0xf3 LB: >> { %v876_v44 = vld [vmem:[%s3811_s19] sm:$0xff]  ;;  %v878_v45 = vld [vmem:[%s3811_s19 + $0x18] sm:$0xff]  ;;  %v880_v46 = vld [vmem:[%s3811_s19 + $0x30] sm:$0xff]  ;;  %s884_s10 = sadd.s32 1, %s3815_s13  ;;  %s870_s18 = sadd.s32 1, %s3819_s18   ;;  %s3819_s18 = sphi %s3817_s18, %s870_s18   ;;  %s3815_s13 = sphi %s3813_s13, %s3814_s13   ;;  %s3811_s19 = sphi %s5037_s19, %s889_s19   ;;  %s3807_s12 = sphi %s5036_s12, %s890_s12  }
  0xf4   : >> { %877 = vst [vmem:[%s3807_s12] sm:$0xff] %v876_v44  ;;  %879 = vst [vmem:[%s3807_s12 + $0x10] sm:$0xff] %v878_v45  ;;  %v882_v47 = vld [vmem:[%s3811_s19 + $0x48] sm:$0xff]  ;;  %p885_p10 = scmp.ge.s32.totalorder %s884_s10, %s4311_s26  ;;  %p869_p11 = scmp.ge.s32.totalorder %s870_s18, %s4311_s26 }
  0xf5   : >> { %881 = vst [vmem:[%s3807_s12 + $0x20] sm:$0xff] %v880_v46  ;;  %883 = vst [vmem:[%s3807_s12 + $0x30] sm:$0xff] %v882_v47 }
  0xf6   : >> { %s5108_s10 = smov (%p885_p10, %s884_s10), 0  ;;  %872 = sbr.rel (!%p869_p11) target bundleno = 243 (0xf3), region = 705 }
  0xf7   : >> { %s2709_s21 = sshll.u32 %s5108_s10, 3  ;;  %s3814_s13 = smov %s5108_s10  }
  0xf8   : >> { %s889_s19 = scalar_lea.vmem %s4315_s24, %s2709_s21   ;;  %s890_s12 = scalar_lea.vmem %s4318_s0, %s2709_s21 [#allocation5]  }
  0xfd PF: > { %896 = sbr.rel (!%p4034_p5) target bundleno = 309 (0x135), region = 228  ;;  %s898_s25 = sand.u32 (%p4034_p5), 1, %s3687_s29  }
  0xfe   : > { %s2712_s22 = sshll.u32 (%p4034_p5), %s3691_s30, 1  ;;  %s2711_s20 = sshll.u32 (%p4034_p5), %s898_s25, 6 }
  0xff   : > { %s902_s23 = ssub.s32 (%p4034_p5), 3, %s2712_s22  ;;  %s2798_s13 = sshll.u32 (%p4034_p5), %s3691_s30, 4 }
 0x100   : > { %p903_p12 = scmp.lt.s32.totalorder (%p4034_p5), %s902_s23, 2  ;;  %s5038_s4 = sld [smem:[#allocation18_spill]] (%p4034_p5) }
 0x101   : > { %s4350_s0 = scalar_lea.vmem (%p4034_p5), [#allocation6], %s2711_s20  }
 0x104   : > { %s5110_s23 = smov (!%p903_p12, %s902_s23), 2 }
 0x105   : > { %s2713_s24 = sshll.u32 %s5110_s23, 9 }
 0x106   : > { %s4347_s26 = scalar_lea.vmem %s5038_s4, %s2798_s13   ;;  %p2716_p13 = scmp.eq.s32.totalorder %s2713_s24, 0 }
 0x107   : > { %s4353_s12 = sshrl.u32 (!%p2716_p13), %s5110_s23, 1 }
 0x108   : > { %911 = sbr.rel (%p2716_p13) target bundleno = 309 (0x135), region = 232  ;;  %p2717_p0 = scmp.le.s32.totalorder (!%p2716_p13), %s4353_s12, 0 }
 0x10f   : > { %2478 = sbr.rel (%p2717_p0) target bundleno = 288 (0x120), region = 710  ;;  %s5039_s10 = smov (!%p2717_p0), %s4350_s0 }
 0x110   : > { %s5040_s21 = smov (!%p2717_p0), %s4347_s26  ;;  %s4362_s25 = smov (!%p2717_p0), 0  }
 0x111   : > { %s4364_s22 = smov (!%p2717_p0), 0  }
 0x116 LB: >> { %v993_v48 = vld [vmem:[%s3827_s21] sm:$0xff]  ;;  %v995_v49 = vld [vmem:[%s3827_s21 + $0x8] sm:$0xff]  ;;  %v997_v50 = vld [vmem:[%s3827_s21 + $0x18] sm:$0xff]  ;;  %s1009_s20 = sadd.s32 1, %s3831_s25  ;;  %s987_s22 = sadd.s32 1, %s3835_s22   ;;  %s3835_s22 = sphi %s4364_s22, %s987_s22   ;;  %s3831_s25 = sphi %s4362_s25, %s5041_s25   ;;  %s3827_s21 = sphi %s5040_s21, %s1014_s21   ;;  %s3823_s10 = sphi %s5039_s10, %s1015_s10  }
 0x117   : >> { %994 = vst [vmem:[%s3823_s10] sm:$0xff] %v993_v48  ;;  %996 = vst [vmem:[%s3823_s10 + $0x8] sm:$0xff] %v995_v49  ;;  %v999_v51 = vld [vmem:[%s3827_s21 + $0x20] sm:$0xff]  ;;  %v1001_v52 = vld [vmem:[%s3827_s21 + $0x30] sm:$0xff]  ;;  %p1010_p1 = scmp.ge.s32.totalorder %s1009_s20, %s4353_s12  ;;  %p986_p2 = scmp.ge.s32.totalorder %s987_s22, %s4353_s12 }
 0x118   : >> { %998 = vst [vmem:[%s3823_s10 + $0x10] sm:$0xff] %v997_v50  ;;  %v1003_v53 = vld [vmem:[%s3827_s21 + $0x38] sm:$0xff]  ;;  %1000 = vst [vmem:[%s3823_s10 + $0x18] sm:$0xff] %v999_v51  ;;  %v1005_v54 = vld [vmem:[%s3827_s21 + $0x48] sm:$0xff] }
 0x119   : >> { %1002 = vst [vmem:[%s3823_s10 + $0x20] sm:$0xff] %v1001_v52  ;;  %1004 = vst [vmem:[%s3823_s10 + $0x28] sm:$0xff] %v1003_v53  ;;  %v1007_v55 = vld [vmem:[%s3827_s21 + $0x50] sm:$0xff]  ;;  %s5112_s20 = smov (%p1010_p1, %s1009_s20), 0  ;;  %989 = sbr.rel (!%p986_p2) target bundleno = 278 (0x116), region = 716 }
 0x11a   : >> { %1006 = vst [vmem:[%s3823_s10 + $0x30] sm:$0xff] %v1005_v54  ;;  %1008 = vst [vmem:[%s3823_s10 + $0x38] sm:$0xff] %v1007_v55  ;;  %s2718_s13 = sshll.u32 %s5112_s20, 4  ;;  %s5041_s25 = smov %s5112_s20 }
 0x11b   : >> { %s1014_s21 = scalar_lea.vmem %s4347_s26, %s2718_s13   ;;  %s1015_s10 = scalar_lea.vmem %s4350_s0, %s2718_s13 [#allocation6]  }
 0x120 PF: > { %s4383_s19 = sand.u32 1, %s5110_s23   ;;  %s2799_s18 = sshll.u32 %s4353_s12, 4 }
 0x121   : > { %s4387_s24 = scalar_lea.vmem %s4347_s26, %s2799_s18   ;;  %s4390_s13 = scalar_lea.vmem %s4350_s0, %s2799_s18 [#allocation6]  }
 0x122   : > { %p2723_p3 = scmp.le.s32.totalorder %s4383_s19, 0 }
 0x123   : > { %s5042_s22 = smov (!%p2723_p3), %s4390_s13  ;;  %s5043_s10 = smov (!%p2723_p3), %s4387_s24 }
 0x124   : > { %2492 = sbr.rel (%p2723_p3) target bundleno = 309 (0x135), region = 721  ;;  %s3845_s21 = smov (!%p2723_p3), 0  }
 0x125   : > { %s3849_s25 = smov (!%p2723_p3), 0  }
 0x12b LB: >> { %v1032_v56 = vld [vmem:[%s3843_s10] sm:$0xff]  ;;  %v1034_v57 = vld [vmem:[%s3843_s10 + $0x18] sm:$0xff]  ;;  %v1036_v58 = vld [vmem:[%s3843_s10 + $0x30] sm:$0xff]  ;;  %s1040_s23 = sadd.s32 1, %s3847_s21  ;;  %s1026_s25 = sadd.s32 1, %s3851_s25   ;;  %s3851_s25 = sphi %s3849_s25, %s1026_s25   ;;  %s3847_s21 = sphi %s3845_s21, %s3846_s21   ;;  %s3843_s10 = sphi %s5043_s10, %s1045_s10   ;;  %s3839_s22 = sphi %s5042_s22, %s1046_s22  }
 0x12c   : >> { %1033 = vst [vmem:[%s3839_s22] sm:$0xff] %v1032_v56  ;;  %1035 = vst [vmem:[%s3839_s22 + $0x10] sm:$0xff] %v1034_v57  ;;  %v1038_v59 = vld [vmem:[%s3843_s10 + $0x48] sm:$0xff]  ;;  %p1041_p4 = scmp.ge.s32.totalorder %s1040_s23, %s4383_s19  ;;  %p1025_p7 = scmp.ge.s32.totalorder %s1026_s25, %s4383_s19 }
 0x12d   : >> { %1037 = vst [vmem:[%s3839_s22 + $0x20] sm:$0xff] %v1036_v58  ;;  %1039 = vst [vmem:[%s3839_s22 + $0x30] sm:$0xff] %v1038_v59 }
 0x12e   : >> { %s5114_s23 = smov (%p1041_p4, %s1040_s23), 0  ;;  %1028 = sbr.rel (!%p1025_p7) target bundleno = 299 (0x12b), region = 727 }
 0x12f   : >> { %s2724_s26 = sshll.u32 %s5114_s23, 3  ;;  %s3846_s21 = smov %s5114_s23  }
 0x130   : >> { %s1045_s10 = scalar_lea.vmem %s4387_s24, %s2724_s26   ;;  %s1046_s22 = scalar_lea.vmem %s4390_s13, %s2724_s26 [#allocation6]  }
 0x135 PF: > { %1052 = sbr.rel (!%p4034_p5) target bundleno = 365 (0x16d), region = 280  ;;  %s1054_s0 = sand.u32 (%p4034_p5), 1, %s3687_s29  }
 0x136   : > { %s2727_s12 = sshll.u32 (%p4034_p5), %s3691_s30, 1  ;;  %s2726_s20 = sshll.u32 (%p4034_p5), %s1054_s0, 6 }
 0x137   : > { %s1058_s18 = ssub.s32 (%p4034_p5), 3, %s2727_s12  ;;  %s2801_s21 = sshll.u32 (%p4034_p5), %s3691_s30, 4 }
 0x138   : > { %p1059_p10 = scmp.lt.s32.totalorder (%p4034_p5), %s1058_s18, 2  ;;  %s5044_s5 = sld [smem:[#allocation19_spill]] (%p4034_p5) }
 0x139   : > { %s4422_s13 = scalar_lea.vmem (%p4034_p5), [#allocation7], %s2726_s20  }
 0x13c   : > { %s5116_s18 = smov (!%p1059_p10, %s1058_s18), 2 }
 0x13d   : > { %s2728_s24 = sshll.u32 %s5116_s18, 9 }
 0x13e   : > { %s4419_s19 = scalar_lea.vmem %s5044_s5, %s2801_s21   ;;  %p2731_p11 = scmp.eq.s32.totalorder %s2728_s24, 0 }
 0x13f   : > { %s4425_s22 = sshrl.u32 (!%p2731_p11), %s5116_s18, 1 }
 0x140   : > { %1067 = sbr.rel (%p2731_p11) target bundleno = 365 (0x16d), region = 284  ;;  %p2732_p12 = scmp.le.s32.totalorder (!%p2731_p11), %s4425_s22, 0 }
 0x147   : > { %2506 = sbr.rel (%p2732_p12) target bundleno = 344 (0x158), region = 732  ;;  %s5045_s23 = smov (!%p2732_p12), %s4422_s13 }
 0x148   : > { %s5046_s26 = smov (!%p2732_p12), %s4419_s19  ;;  %s4434_s0 = smov (!%p2732_p12), 0  }
 0x149   : > { %s4436_s12 = smov (!%p2732_p12), 0  }
 0x14e LB: >> { %v1149_v60 = vld [vmem:[%s3859_s26] sm:$0xff]  ;;  %v1151_v61 = vld [vmem:[%s3859_s26 + $0x8] sm:$0xff]  ;;  %v1153_v62 = vld [vmem:[%s3859_s26 + $0x18] sm:$0xff]  ;;  %s1165_s20 = sadd.s32 1, %s3863_s0  ;;  %s1143_s12 = sadd.s32 1, %s3867_s12   ;;  %s3867_s12 = sphi %s4436_s12, %s1143_s12   ;;  %s3863_s0 = sphi %s4434_s0, %s5047_s0   ;;  %s3859_s26 = sphi %s5046_s26, %s1170_s26   ;;  %s3855_s23 = sphi %s5045_s23, %s1171_s23  }
 0x14f   : >> { %1150 = vst [vmem:[%s3855_s23] sm:$0xff] %v1149_v60  ;;  %1152 = vst [vmem:[%s3855_s23 + $0x8] sm:$0xff] %v1151_v61  ;;  %v1155_v63 = vld [vmem:[%s3859_s26 + $0x20] sm:$0xff]  ;;  %v1157_v0 = vld [vmem:[%s3859_s26 + $0x30] sm:$0xff]  ;;  %p1166_p13 = scmp.ge.s32.totalorder %s1165_s20, %s4425_s22  ;;  %p1142_p0 = scmp.ge.s32.totalorder %s1143_s12, %s4425_s22 }
 0x150   : >> { %1154 = vst [vmem:[%s3855_s23 + $0x10] sm:$0xff] %v1153_v62  ;;  %v1159_v1 = vld [vmem:[%s3859_s26 + $0x38] sm:$0xff]  ;;  %1156 = vst [vmem:[%s3855_s23 + $0x18] sm:$0xff] %v1155_v63  ;;  %v1161_v2 = vld [vmem:[%s3859_s26 + $0x48] sm:$0xff] }
 0x151   : >> { %1158 = vst [vmem:[%s3855_s23 + $0x20] sm:$0xff] %v1157_v0  ;;  %1160 = vst [vmem:[%s3855_s23 + $0x28] sm:$0xff] %v1159_v1  ;;  %v1163_v3 = vld [vmem:[%s3859_s26 + $0x50] sm:$0xff]  ;;  %s5118_s20 = smov (%p1166_p13, %s1165_s20), 0  ;;  %1145 = sbr.rel (!%p1142_p0) target bundleno = 334 (0x14e), region = 738 }
 0x152   : >> { %1162 = vst [vmem:[%s3855_s23 + $0x30] sm:$0xff] %v1161_v2  ;;  %1164 = vst [vmem:[%s3855_s23 + $0x38] sm:$0xff] %v1163_v3  ;;  %s2733_s21 = sshll.u32 %s5118_s20, 4  ;;  %s5047_s0 = smov %s5118_s20 }
 0x153   : >> { %s1170_s26 = scalar_lea.vmem %s4419_s19, %s2733_s21   ;;  %s1171_s23 = scalar_lea.vmem %s4422_s13, %s2733_s21 [#allocation7]  }
 0x158 PF: > { %s4455_s10 = sand.u32 1, %s5116_s18   ;;  %s2802_s25 = sshll.u32 %s4425_s22, 4 }
 0x159   : > { %s4459_s24 = scalar_lea.vmem %s4419_s19, %s2802_s25   ;;  %s4462_s21 = scalar_lea.vmem %s4422_s13, %s2802_s25 [#allocation7]  }
 0x15a   : > { %p2738_p1 = scmp.le.s32.totalorder %s4455_s10, 0 }
 0x15b   : > { %s5048_s12 = smov (!%p2738_p1), %s4462_s21  ;;  %s5049_s23 = smov (!%p2738_p1), %s4459_s24 }
 0x15c   : > { %2520 = sbr.rel (%p2738_p1) target bundleno = 365 (0x16d), region = 743  ;;  %s3877_s26 = smov (!%p2738_p1), 0  }
 0x15d   : > { %s3881_s0 = smov (!%p2738_p1), 0  }
 0x163 LB: >> { %v1188_v4 = vld [vmem:[%s3875_s23] sm:$0xff]  ;;  %v1190_v5 = vld [vmem:[%s3875_s23 + $0x18] sm:$0xff]  ;;  %v1192_v6 = vld [vmem:[%s3875_s23 + $0x30] sm:$0xff]  ;;  %s1196_s18 = sadd.s32 1, %s3879_s26  ;;  %s1182_s0 = sadd.s32 1, %s3883_s0   ;;  %s3883_s0 = sphi %s3881_s0, %s1182_s0   ;;  %s3879_s26 = sphi %s3877_s26, %s3878_s26   ;;  %s3875_s23 = sphi %s5049_s23, %s1201_s23   ;;  %s3871_s12 = sphi %s5048_s12, %s1202_s12  }
 0x164   : >> { %1189 = vst [vmem:[%s3871_s12] sm:$0xff] %v1188_v4  ;;  %1191 = vst [vmem:[%s3871_s12 + $0x10] sm:$0xff] %v1190_v5  ;;  %v1194_v7 = vld [vmem:[%s3875_s23 + $0x48] sm:$0xff]  ;;  %p1197_p2 = scmp.ge.s32.totalorder %s1196_s18, %s4455_s10  ;;  %p1181_p3 = scmp.ge.s32.totalorder %s1182_s0, %s4455_s10 }
 0x165   : >> { %1193 = vst [vmem:[%s3871_s12 + $0x20] sm:$0xff] %v1192_v6  ;;  %1195 = vst [vmem:[%s3871_s12 + $0x30] sm:$0xff] %v1194_v7 }
 0x166   : >> { %s5120_s18 = smov (%p1197_p2, %s1196_s18), 0  ;;  %1184 = sbr.rel (!%p1181_p3) target bundleno = 355 (0x163), region = 749 }
 0x167   : >> { %s2739_s19 = sshll.u32 %s5120_s18, 3  ;;  %s3878_s26 = smov %s5120_s18  }
 0x168   : >> { %s1201_s23 = scalar_lea.vmem %s4459_s24, %s2739_s19   ;;  %s1202_s12 = scalar_lea.vmem %s4462_s21, %s2739_s19 [#allocation7]  }
 0x16d PF: > { %1208 = sbr.rel (!%p4034_p5) target bundleno = 421 (0x1a5), region = 332  ;;  %s1210_s13 = sand.u32 (%p4034_p5), 1, %s3687_s29  }
 0x16e   : > { %s2742_s22 = sshll.u32 (%p4034_p5), %s3691_s30, 1  ;;  %s2741_s20 = sshll.u32 (%p4034_p5), %s1210_s13, 6 }
 0x16f   : > { %s1214_s25 = ssub.s32 (%p4034_p5), 3, %s2742_s22  ;;  %s2804_s26 = sshll.u32 (%p4034_p5), %s3691_s30, 4 }
 0x170   : > { %p1215_p4 = scmp.lt.s32.totalorder (%p4034_p5), %s1214_s25, 2  ;;  %s5050_s6 = sld [smem:[#allocation20_spill]] (%p4034_p5) }
 0x171   : > { %s4494_s21 = scalar_lea.vmem (%p4034_p5), [#allocation8], %s2741_s20  }
 0x174   : > { %s5122_s25 = smov (!%p1215_p4, %s1214_s25), 2 }
 0x175   : > { %s2743_s24 = sshll.u32 %s5122_s25, 9 }
 0x176   : > { %s4491_s10 = scalar_lea.vmem %s5050_s6, %s2804_s26   ;;  %p2746_p7 = scmp.eq.s32.totalorder %s2743_s24, 0 }
 0x177   : > { %s4497_s12 = sshrl.u32 (!%p2746_p7), %s5122_s25, 1 }
 0x178   : > { %1223 = sbr.rel (%p2746_p7) target bundleno = 421 (0x1a5), region = 336  ;;  %p2747_p10 = scmp.le.s32.totalorder (!%p2746_p7), %s4497_s12, 0 }
 0x17f   : > { %2534 = sbr.rel (%p2747_p10) target bundleno = 400 (0x190), region = 754  ;;  %s5051_s18 = smov (!%p2747_p10), %s4494_s21 }
 0x180   : > { %s5052_s19 = smov (!%p2747_p10), %s4491_s10  ;;  %s4506_s13 = smov (!%p2747_p10), 0  }
 0x181   : > { %s4508_s22 = smov (!%p2747_p10), 0  }
 0x186 LB: >> { %v1305_v8 = vld [vmem:[%s3891_s19] sm:$0xff]  ;;  %v1307_v9 = vld [vmem:[%s3891_s19 + $0x8] sm:$0xff]  ;;  %v1309_v10 = vld [vmem:[%s3891_s19 + $0x18] sm:$0xff]  ;;  %s1321_s20 = sadd.s32 1, %s3895_s13  ;;  %s1299_s22 = sadd.s32 1, %s3899_s22   ;;  %s3899_s22 = sphi %s4508_s22, %s1299_s22   ;;  %s3895_s13 = sphi %s4506_s13, %s5053_s13   ;;  %s3891_s19 = sphi %s5052_s19, %s1326_s19   ;;  %s3887_s18 = sphi %s5051_s18, %s1327_s18  }
 0x187   : >> { %1306 = vst [vmem:[%s3887_s18] sm:$0xff] %v1305_v8  ;;  %1308 = vst [vmem:[%s3887_s18 + $0x8] sm:$0xff] %v1307_v9  ;;  %v1311_v11 = vld [vmem:[%s3891_s19 + $0x20] sm:$0xff]  ;;  %v1313_v12 = vld [vmem:[%s3891_s19 + $0x30] sm:$0xff]  ;;  %p1322_p11 = scmp.ge.s32.totalorder %s1321_s20, %s4497_s12  ;;  %p1298_p12 = scmp.ge.s32.totalorder %s1299_s22, %s4497_s12 }
 0x188   : >> { %1310 = vst [vmem:[%s3887_s18 + $0x10] sm:$0xff] %v1309_v10  ;;  %v1315_v13 = vld [vmem:[%s3891_s19 + $0x38] sm:$0xff]  ;;  %1312 = vst [vmem:[%s3887_s18 + $0x18] sm:$0xff] %v1311_v11  ;;  %v1317_v14 = vld [vmem:[%s3891_s19 + $0x48] sm:$0xff] }
 0x189   : >> { %1314 = vst [vmem:[%s3887_s18 + $0x20] sm:$0xff] %v1313_v12  ;;  %1316 = vst [vmem:[%s3887_s18 + $0x28] sm:$0xff] %v1315_v13  ;;  %v1319_v15 = vld [vmem:[%s3891_s19 + $0x50] sm:$0xff]  ;;  %s5124_s20 = smov (%p1322_p11, %s1321_s20), 0  ;;  %1301 = sbr.rel (!%p1298_p12) target bundleno = 390 (0x186), region = 760 }
 0x18a   : >> { %1318 = vst [vmem:[%s3887_s18 + $0x30] sm:$0xff] %v1317_v14  ;;  %1320 = vst [vmem:[%s3887_s18 + $0x38] sm:$0xff] %v1319_v15  ;;  %s2748_s26 = sshll.u32 %s5124_s20, 4  ;;  %s5053_s13 = smov %s5124_s20 }
 0x18b   : >> { %s1326_s19 = scalar_lea.vmem %s4491_s10, %s2748_s26   ;;  %s1327_s18 = scalar_lea.vmem %s4494_s21, %s2748_s26 [#allocation8]  }
 0x190 PF: > { %s4527_s23 = sand.u32 1, %s5122_s25   ;;  %s2805_s0 = sshll.u32 %s4497_s12, 4 }
 0x191   : > { %s4531_s24 = scalar_lea.vmem %s4491_s10, %s2805_s0   ;;  %s4534_s26 = scalar_lea.vmem %s4494_s21, %s2805_s0 [#allocation8]  }
 0x192   : > { %p2753_p13 = scmp.le.s32.totalorder %s4527_s23, 0 }
 0x193   : > { %s5054_s22 = smov (!%p2753_p13), %s4534_s26  ;;  %s5055_s18 = smov (!%p2753_p13), %s4531_s24 }
 0x194   : > { %2548 = sbr.rel (%p2753_p13) target bundleno = 421 (0x1a5), region = 765  ;;  %s3909_s19 = smov (!%p2753_p13), 0  }
 0x195   : > { %s3913_s13 = smov (!%p2753_p13), 0  }
 0x19b LB: >> { %v1344_v16 = vld [vmem:[%s3907_s18] sm:$0xff]  ;;  %v1346_v17 = vld [vmem:[%s3907_s18 + $0x18] sm:$0xff]  ;;  %v1348_v18 = vld [vmem:[%s3907_s18 + $0x30] sm:$0xff]  ;;  %s1352_s25 = sadd.s32 1, %s3911_s19  ;;  %s1338_s13 = sadd.s32 1, %s3915_s13   ;;  %s3915_s13 = sphi %s3913_s13, %s1338_s13   ;;  %s3911_s19 = sphi %s3909_s19, %s3910_s19   ;;  %s3907_s18 = sphi %s5055_s18, %s1357_s18   ;;  %s3903_s22 = sphi %s5054_s22, %s1358_s22  }
 0x19c   : >> { %1345 = vst [vmem:[%s3903_s22] sm:$0xff] %v1344_v16  ;;  %1347 = vst [vmem:[%s3903_s22 + $0x10] sm:$0xff] %v1346_v17  ;;  %v1350_v19 = vld [vmem:[%s3907_s18 + $0x48] sm:$0xff]  ;;  %p1353_p0 = scmp.ge.s32.totalorder %s1352_s25, %s4527_s23  ;;  %p1337_p1 = scmp.ge.s32.totalorder %s1338_s13, %s4527_s23 }
 0x19d   : >> { %1349 = vst [vmem:[%s3903_s22 + $0x20] sm:$0xff] %v1348_v18  ;;  %1351 = vst [vmem:[%s3903_s22 + $0x30] sm:$0xff] %v1350_v19 }
 0x19e   : >> { %s5126_s25 = smov (%p1353_p0, %s1352_s25), 0  ;;  %1340 = sbr.rel (!%p1337_p1) target bundleno = 411 (0x19b), region = 771 }
 0x19f   : >> { %s2754_s10 = sshll.u32 %s5126_s25, 3  ;;  %s3910_s19 = smov %s5126_s25  }
 0x1a0   : >> { %s1357_s18 = scalar_lea.vmem %s4531_s24, %s2754_s10   ;;  %s1358_s22 = scalar_lea.vmem %s4534_s26, %s2754_s10 [#allocation8]  }
 0x1a5 PF: > { %1364 = sbr.rel (!%p4034_p5) target bundleno = 477 (0x1dd), region = 384  ;;  %s1366_s21 = sand.u32 (%p4034_p5), 1, %s3687_s29  }
 0x1a6   : > { %s2757_s12 = sshll.u32 (%p4034_p5), %s3691_s30, 1  ;;  %s2756_s20 = sshll.u32 (%p4034_p5), %s1366_s21, 5 }
 0x1a7   : > { %s1370_s0 = ssub.s32 (%p4034_p5), 3, %s2757_s12  ;;  %s2807_s19 = sshll.u32 (%p4034_p5), %s3691_s30, 4 }
 0x1a8   : > { %p1371_p2 = scmp.lt.s32.totalorder (%p4034_p5), %s1370_s0, 2  ;;  %s5056_s7 = sld [smem:[#allocation21_spill]] (%p4034_p5) }
 0x1a9   : > { %s4566_s15 = scalar_lea.vmem (%p4034_p5), [#allocation9], %s2756_s20  }
 0x1ac   : > { %s5128_s0 = smov (!%p1371_p2, %s1370_s0), 2 }
 0x1ad   : > { %s2758_s24 = sshll.u32 %s5128_s0, 8 }
 0x1ae   : > { %s4563_s23 = scalar_lea.vmem %s5056_s7, %s2807_s19   ;;  %p2761_p5 = scmp.eq.s32.totalorder %s2758_s24, 0 }
 0x1af   : > { %s4569_s26 = sshrl.u32 (!%p2761_p5), %s5128_s0, 1 }
 0x1b0   : > { %1379 = sbr.rel (%p2761_p5) target bundleno = 477 (0x1dd), region = 388  ;;  %p2762_p3 = scmp.le.s32.totalorder (!%p2761_p5), %s4569_s26, 0 }
 0x1b7   : > { %2562 = sbr.rel (%p2762_p3) target bundleno = 456 (0x1c8), region = 776  ;;  %s5057_s22 = smov (!%p2762_p3), %s4566_s15 }
 0x1b8   : > { %s5058_s25 = smov (!%p2762_p3), %s4563_s23  ;;  %s4578_s10 = smov (!%p2762_p3), 0  }
 0x1b9   : > { %s3929_s21 = smov (!%p2762_p3), 0  }
 0x1be LB: >> { %v1449_v20 = vld [vmem:[%s3923_s25] sm:$0xff]  ;;  %v1451_v21 = vld [vmem:[%s3923_s25 + $0x8] sm:$0xff]  ;;  %v1453_v22 = vld [vmem:[%s3923_s25 + $0x18] sm:$0xff]  ;;  %s1457_s12 = sadd.s32 1, %s3927_s10  ;;  %s1443_s21 = sadd.s32 1, %s3931_s21   ;;  %s3931_s21 = sphi %s3929_s21, %s1443_s21   ;;  %s3927_s10 = sphi %s4578_s10, %s5059_s10   ;;  %s3923_s25 = sphi %s5058_s25, %s1462_s25   ;;  %s3919_s22 = sphi %s5057_s22, %s1463_s22  }
 0x1bf   : >> { %1450 = vst [vmem:[%s3919_s22] sm:$0xff] %v1449_v20  ;;  %1452 = vst [vmem:[%s3919_s22 + $0x8] sm:$0xff] %v1451_v21  ;;  %v1455_v23 = vld [vmem:[%s3923_s25 + $0x20] sm:$0xff]  ;;  %p1458_p4 = scmp.ge.s32.totalorder %s1457_s12, %s4569_s26  ;;  %p1442_p7 = scmp.ge.s32.totalorder %s1443_s21, %s4569_s26 }
 0x1c0   : >> { %1454 = vst [vmem:[%s3919_s22 + $0x10] sm:$0xff] %v1453_v22  ;;  %1456 = vst [vmem:[%s3919_s22 + $0x18] sm:$0xff] %v1455_v23 }
 0x1c1   : >> { %s5130_s12 = smov (%p1458_p4, %s1457_s12), 0  ;;  %1445 = sbr.rel (!%p1442_p7) target bundleno = 446 (0x1be), region = 782 }
 0x1c2   : >> { %s2763_s20 = sshll.u32 %s5130_s12, 4  ;;  %s5059_s10 = smov %s5130_s12 }
 0x1c3   : >> { %s1462_s25 = scalar_lea.vmem %s4563_s23, %s2763_s20   ;;  %s1463_s22 = scalar_lea.vmem %s4566_s15, %s2763_s20 [#allocation9]  }
 0x1c8 PF: > { %s4594_s19 = sand.u32 1, %s5128_s0   ;;  %s2808_s18 = sshll.u32 %s4569_s26, 4 }
 0x1c9   : > { %s4598_s13 = scalar_lea.vmem %s4563_s23, %s2808_s18   ;;  %s1470_s24 = scalar_lea.vmem %s4566_s15, %s2808_s18 [#allocation9]  }
 0x1ca   : > { %p2768_p10 = scmp.le.s32.totalorder %s4594_s19, 0 }
 0x1cb   : > { %s3933_s10 = smov (!%p2768_p10), %s1470_s24   ;;  %s3937_s20 = smov (!%p2768_p10), %s4598_s13  }
 0x1cc   : > { %2576 = sbr.rel (%p2768_p10) target bundleno = 477 (0x1dd), region = 787  ;;  %s3941_s12 = smov (!%p2768_p10), 0  }
 0x1cd   : > { %s3945_s21 = smov (!%p2768_p10), 0  }
 0x1d3 LB: >> { %v1480_v24 = vld [vmem:[%s3939_s20] sm:$0xff]  ;;  %v1482_v25 = vld [vmem:[%s3939_s20 + $0x18] sm:$0xff]  ;;  %s1484_s0 = sadd.s32 1, %s3943_s12  ;;  %s1474_s21 = sadd.s32 1, %s3947_s21   ;;  %s3947_s21 = sphi %s3945_s21, %s1474_s21   ;;  %s3943_s12 = sphi %s3941_s12, %s3942_s12   ;;  %s3939_s20 = sphi %s3937_s20, %s1489_s20   ;;  %s3935_s10 = sphi %s3933_s10, %s1490_s10  }
 0x1d4   : >> { %1481 = vst [vmem:[%s3935_s10] sm:$0xff] %v1480_v24  ;;  %1483 = vst [vmem:[%s3935_s10 + $0x10] sm:$0xff] %v1482_v25  ;;  %p1485_p11 = scmp.ge.s32.totalorder %s1484_s0, %s4594_s19  ;;  %p1473_p12 = scmp.ge.s32.totalorder %s1474_s21, %s4594_s19 }
 0x1d6   : >> { %s5132_s0 = smov (%p1485_p11, %s1484_s0), 0  ;;  %1476 = sbr.rel (!%p1473_p12) target bundleno = 467 (0x1d3), region = 793 }
 0x1d7   : >> { %s2769_s23 = sshll.u32 %s5132_s0, 3  ;;  %s3942_s12 = smov %s5132_s0  }
 0x1d8   : >> { %s1489_s20 = scalar_lea.vmem %s4598_s13, %s2769_s23   ;;  %s1490_s10 = scalar_lea.vmem %s1470_s24, %s2769_s23 [#allocation9]  }
 0x1dd PF: > { %p2771_p13 = scmp.ge.s32.totalorder %s3691_s30, 1  ;;  %p1495_p0 = scmp.lt.s32.totalorder %s3691_s30, 3 }
 0x1df   : > { %p1496_p1 = pnand %p2771_p13, %p1495_p0 }
 0x1e0   : > { %s4609_s15 = sand.u32 (!%p1496_p1), 1, %s3683_s28   ;;  %s2781_s26 = sshll.u32 (!%p1496_p1), %s4016_s9, 4  ;;  %v1687_v26 = vlaneseq (!%p1496_p1)  ;;  %vm1672_vm0 = vcmask (!%p1496_p1), 130048  }
 0x1e1   : > { %1499 = sbr.rel (%p1496_p1) target bundleno = 784 (0x310), region = 436  ;;  %s4613_s22 = sshll.u32 (!%p1496_p1), %s4609_s15, 6 }
 0x1e2   : > { %s2779_s25 = sshll.u32 (!%p1496_p1), %s4609_s15, 5  ;;  %v1688_v27 = vshrl.u32 (!%p1496_p1), %v1687_v26, 7  ;;  %s1546_s19 = scalar_lea.vmem (!%p1496_p1), [#allocation8], %s4613_s22 }
 0x1e3   : > { %v4617_v28 = vld [vmem:[%s1546_s19] sm:$0xff] (!%p1496_p1)  ;;  %v4619_v29 = vld [vmem:[%s1546_s19 + $0x8] sm:$0xff] (!%p1496_p1)  ;;  %v4621_v30 = vld [vmem:[%s1546_s19 + $0x10] sm:$0xff] (!%p1496_p1)  ;;  %s4623_s18 = ssub.s32 (!%p1496_p1), 20, %s2781_s26  ;;  %s1553_s13 = scalar_lea.vmem (!%p1496_p1), [#allocation9], %s2779_s25 }
 0x1e4   : > { %v4625_v31 = vld [vmem:[%s1546_s19 + $0x18] sm:$0xff] (!%p1496_p1)  ;;  %v4627_v32 = vld [vmem:[%s1546_s19 + $0x20] sm:$0xff] (!%p1496_p1)  ;;  %v4629_v33 = vld [vmem:[%s1546_s19 + $0x28] sm:$0xff] (!%p1496_p1)  ;;  %v1664_v34 = vmul.f32 (!%p1496_p1), %v4617_v28, %v4617_v28  ;;  %v1665_v35 = vmul.f32 (!%p1496_p1), %v4619_v29, %v4619_v29  ;;  %v1666_v36 = vmul.f32 (!%p1496_p1), %v4621_v30, %v4621_v30  ;;  %v1689_v37 = vadd.s32 (!%p1496_p1), 8, %v1688_v27  ;;  %s1518_s24 = scalar_lea.vmem (!%p1496_p1), [#allocation4], %s4613_s22  ;;  %s4674_s10 = scalar_lea.vmem (!%p1496_p1), [#allocation2], %s4613_s22 }
 0x1e5   : > { %v4637_v38 = vld [vmem:[%s1546_s19 + $0x30] sm:$0xff] (!%p1496_p1)  ;;  %v4639_v39 = vld [vmem:[%s1546_s19 + $0x38] sm:$0xff] (!%p1496_p1)  ;;  %v1667_v40 = vmul.f32 (!%p1496_p1), %v4625_v31, %v4625_v31  ;;  %v1668_v41 = vmul.f32 (!%p1496_p1), %v4627_v32, %v4627_v32  ;;  %v1669_v42 = vmul.f32 (!%p1496_p1), %v4629_v33, %v4629_v33  ;;  %v1702_v43 = vstv (!%p1496_p1), %s4623_s18  ;;  %v1660_v44 = vld [vmem:[%s1553_s13] sm:$0xff] (!%p1496_p1)  ;;  %s4769_s20 = scalar_lea.vmem (!%p1496_p1), [#allocation5], %s4613_s22  ;;  %s4804_s12 = scalar_lea.vmem (!%p1496_p1), [#allocation3], %s4613_s22 }
 0x1e6   : > { %v1661_v45 = vld [vmem:[%s1553_s13 + $0x8] sm:$0xff] (!%p1496_p1)  ;;  %v1670_v46 = vmul.f32 (!%p1496_p1), %v4637_v38, %v4637_v38  ;;  %v1671_v47 = vmul.f32 (!%p1496_p1), %v4639_v39, %v4639_v39  ;;  %v1673_v48 = vsel (!%p1496_p1), %vm1672_vm0, %v1664_v34, 0.0  ;;  %v1674_v49 = vsel (!%p1496_p1), %vm1672_vm0, %v1666_v36, 0.0  ;;  %v1662_v50 = vld [vmem:[%s1553_s13 + $0x10] sm:$0xff] (!%p1496_p1)  ;;  %v1663_v51 = vld [vmem:[%s1553_s13 + $0x18] sm:$0xff] (!%p1496_p1)  ;;  %s4844_s21 = scalar_lea.vmem (!%p1496_p1), [#allocation7], %s4613_s22 }
 0x1e7   : > { %v1675_v52 = vadd.f32 (!%p1496_p1), %v1674_v49, %v1673_v48  ;;  %v1676_v53 = vsel (!%p1496_p1), %vm1672_vm0, %v1665_v35, 0.0  ;;  %v1677_v54 = vsel (!%p1496_p1), %vm1672_vm0, %v1667_v40, 0.0  ;;  %v1679_v55 = vsel (!%p1496_p1), %vm1672_vm0, %v1668_v41, 0.0  ;;  %v1825_v60 = vld [vmem:[%s1518_s24] sm:$0xff] (!%p1496_p1)  ;;  %v1826_v61 = vld [vmem:[%s1518_s24 + $0x8] sm:$0xff] (!%p1496_p1)  ;;  %v1827_v62 = vld [vmem:[%s1518_s24 + $0x10] sm:$0xff] (!%p1496_p1) }
 0x1e8   : > { %v1678_v56 = vadd.f32 %v1677_v54, %v1676_v53  ;;  %v1680_v57 = vsel %vm1672_vm0, %v1670_v46, 0.0  ;;  %v1682_v58 = vsel %vm1672_vm0, %v1669_v42, 0.0  ;;  %v1683_v59 = vsel %vm1672_vm0, %v1671_v47, 0.0  ;;  %v1828_v1 = vld [vmem:[%s1518_s24 + $0x18] sm:$0xff]  ;;  %v1829_v2 = vld [vmem:[%s1518_s24 + $0x20] sm:$0xff]  ;;  %v1830_v3 = vld [vmem:[%s1518_s24 + $0x28] sm:$0xff] }
 0x1e9   : > { %v1681_v63 = vadd.f32 %v1680_v57, %v1679_v55  ;;  %v1684_v0 = vadd.f32 %v1683_v59, %v1682_v58  ;;  %vm1690_vm1 = vcmp.ge.f32.partialorder %v1660_v44, 0.5  ;;  %vm1691_vm2 = vcmp.ge.f32.partialorder %v1661_v45, 0.5  ;;  %v1831_v4 = vld [vmem:[%s1518_s24 + $0x30] sm:$0xff]  ;;  %v1832_v5 = vld [vmem:[%s1518_s24 + $0x38] sm:$0xff]  ;;  %v1709_v9 = vld [vmem:[%s4674_s10] sm:$0xff]  ;;  %s4884_s0 = scalar_lea.vmem [#allocation6], %s4613_s22 }
 0x1ea   : > { %vm1692_vm3 = vcmp.ge.f32.partialorder %v1662_v50, 0.5  ;;  %vm1693_vm4 = vcmp.ge.f32.partialorder %v1663_v51, 0.5  ;;  %vm1694_vm5 = vcmp.lt.f32.partialorder %v1675_v52, 144.0  ;;  %vm1695_vm6 = vcmp.lt.f32.partialorder %v1678_v56, 144.0  ;;  %v1710_v15 = vld [vmem:[%s4674_s10 + $0x8] sm:$0xff]  ;;  %v1711_v25 = vld [vmem:[%s4674_s10 + $0x10] sm:$0xff] }
 0x1eb   : > { %vm1696_vm7 = vcmp.lt.f32.partialorder %v1681_v63, 144.0  ;;  %vm1697_vm8 = vcmp.lt.f32.partialorder %v1684_v0, 144.0  ;;  %vm4661_vm9 = vmand %vm1690_vm1, %vm1694_vm5  ;;  %vm4665_vm10 = vcmp.lt.s32.totalorder %v1688_v27, %v1702_v43  ;;  %vm4669_vm11 = vcmp.lt.s32.totalorder %v1689_v37, %v1702_v43  ;;  %v1712_v50 = vld [vmem:[%s4674_s10 + $0x18] sm:$0xff]  ;;  %v1713_v51 = vld [vmem:[%s4674_s10 + $0x20] sm:$0xff]  ;;  %s2783_s3 = sshll.u32 %s4016_s9, 7 }
 0x1ec   : > { %vm4678_vm12 = vmand %vm1691_vm2, %vm1695_vm6  ;;  %v1833_v11 = vsub.f32 %v1825_v60, %v4617_v28  ;;  %v1834_v12 = vsub.f32 %v1826_v61, %v4619_v29  ;;  %v1835_v13 = vsub.f32 %v1827_v62, %v4621_v30  ;;  %v1836_v14 = vsub.f32 %v1828_v1, %v4625_v31  ;;  %v1714_v57 = vld [vmem:[%s4674_s10 + $0x28] sm:$0xff]  ;;  %v1715_v61 = vld [vmem:[%s4674_s10 + $0x30] sm:$0xff] }
 0x1ed   : > { %vm4688_vm13 = vmand %vm1692_vm3, %vm1696_vm7  ;;  %v1837_v17 = vsub.f32 %v1829_v2, %v4627_v32  ;;  %v1838_v18 = vsub.f32 %v1830_v3, %v4629_v33  ;;  %v1839_v19 = vsub.f32 %v1831_v4, %v4637_v38  ;;  %v1840_v20 = vsub.f32 %v1832_v5, %v4639_v39  ;;  %v1716_v1 = vld [vmem:[%s4674_s10 + $0x38] sm:$0xff]  ;;  %v1883_v16 = vld [vmem:[%s4769_s20] sm:$0xff] }
 0x1ee   : > { %vm4698_vm14 = vmand %vm1693_vm4, %vm1697_vm8  ;;  %v1841_v22 = vand.u32 2147483647, %v1833_v11  ;;  %v1842_v23 = vand.u32 2147483647, %v1834_v12  ;;  %v1843_v24 = vand.u32 2147483647, %v1835_v13  ;;  %v1717_v26 = vsub.f32 %v1709_v9, %v4617_v28 }
 0x1ef   : > { %vm4708_vm15 = vmand %vm4661_vm9, %vm4665_vm10  ;;  %v1844_v34 = vand.u32 2147483647, %v1836_v14  ;;  %v1845_v35 = vand.u32 2147483647, %v1837_v17  ;;  %v1846_v36 = vand.u32 2147483647, %v1838_v18  ;;  %v1718_v37 = vsub.f32 %v1710_v15, %v4619_v29 }
 0x1f0   : > { %vm4717_vm1 = vmand %vm4678_vm12, %vm4669_vm11  ;;  %v1847_v41 = vand.u32 2147483647, %v1839_v19  ;;  %v1848_v42 = vand.u32 2147483647, %v1840_v20  ;;  %v1849_v43 = vsel %vm1672_vm0, %v1841_v22, 0.0  ;;  %v1850_v44 = vsel %vm1672_vm0, %v1843_v24, 0.0 }
 0x1f1   : > { %vm4727_vm2 = vmand %vm4688_vm13, %vm4665_vm10  ;;  %v1851_v46 = vadd.f32 %v1850_v44, %v1849_v43  ;;  %v1852_v47 = vsel %vm1672_vm0, %v1842_v23, 0.0  ;;  %v1853_v48 = vsel %vm1672_vm0, %v1844_v34, 0.0  ;;  %v1855_v49 = vsel %vm1672_vm0, %v1845_v35, 0.0  ;;  %v1885_v44 = vld [vmem:[%s4769_s20 + $0x10] sm:$0xff] }
 0x1f2   : > { %vm4740_vm3 = vmand %vm4698_vm14, %vm4669_vm11  ;;  %v1854_v53 = vadd.f32 %v1853_v48, %v1852_v47  ;;  %v1856_v54 = vsel %vm1672_vm0, %v1847_v41, 0.0  ;;  %v1858_v55 = vsel %vm1672_vm0, %v1846_v36, 0.0  ;;  %v1859_v56 = vsel %vm1672_vm0, %v1848_v42, 0.0  ;;  %v1884_v36 = vld [vmem:[%s4769_s20 + $0x8] sm:$0xff] }
 0x1f3   : > { %v1857_v58 = vadd.f32 %v1856_v54, %v1855_v49  ;;  %v1860_v59 = vadd.f32 %v1859_v56, %v1858_v55  ;;  %v1861_v60 = vsel %vm4708_vm15, %v1851_v46, 0.0  ;;  %v1719_v62 = vsub.f32 %v1711_v25, %v4621_v30  ;;  %v1886_v46 = vld [vmem:[%s4769_s20 + $0x18] sm:$0xff]  ;;  %v1888_v56 = vld [vmem:[%s4769_s20 + $0x28] sm:$0xff] }
 0x1f4   : > { %v1862_v63 = vsel %vm4717_vm1, %v1854_v53, 0.0  ;;  %v1865_v0 = vsel %vm1672_vm0, %v1861_v60, 0.0  ;;  %v1720_v2 = vsub.f32 %v1712_v50, %v4625_v31  ;;  %v1721_v3 = vsub.f32 %v1713_v51, %v4627_v32  ;;  %v1887_v50 = vld [vmem:[%s4769_s20 + $0x20] sm:$0xff] }
 0x1f5   : > { %v1863_v4 = vsel %vm4727_vm2, %v1857_v58, 0.0  ;;  %v1864_v5 = vsel %vm4740_vm3, %v1860_v59, 0.0  ;;  %v1866_v6 = vsel %vm1672_vm0, %v1862_v63, 0.0  ;;  %v1722_v7 = vsub.f32 %v1714_v57, %v4629_v33  ;;  %v1889_v57 = vld [vmem:[%s4769_s20 + $0x30] sm:$0xff]  ;;  %v1890_v58 = vld [vmem:[%s4769_s20 + $0x38] sm:$0xff]  ;;  %s2780_s20 = sshll.u32 %s4609_s15, 3 }
 0x1f6   : > { %v1867_v8 = vadd.f32 %v1866_v6, %v1865_v0  ;;  %v1868_v9 = vsel %vm1672_vm0, %v1863_v4, 0.0  ;;  %v1870_v10 = vsel %vm1672_vm0, %v1864_v5, 0.0  ;;  %v1723_v11 = vsub.f32 %v1715_v61, %v4637_v38  ;;  %v1767_v4 = vld [vmem:[%s4804_s12] sm:$0xff]  ;;  %s1611_s4 = scalar_lea.vmem [#allocation10], %s2780_s20 }
 0x1f7   : > { %v1724_v12 = vsub.f32 %v1716_v1, %v4639_v39  ;;  %v1725_v13 = vand.u32 2147483647, %v1717_v26  ;;  %v1726_v14 = vand.u32 2147483647, %v1718_v37  ;;  %v1727_v15 = vand.u32 2147483647, %v1719_v62 }
 0x1f8   : > { %v1869_v17 = vadd.f32 %v1868_v9, %v1867_v8  ;;  %v1728_v18 = vand.u32 2147483647, %v1720_v2  ;;  %v1729_v19 = vand.u32 2147483647, %v1721_v3  ;;  %v1730_v20 = vand.u32 2147483647, %v1722_v7 }
 0x1f9   : > { %v1731_v21 = vand.u32 2147483647, %v1723_v11  ;;  %v1732_v22 = vand.u32 2147483647, %v1724_v12  ;;  %v1733_v23 = vsel %vm1672_vm0, %v1725_v13, 0.0  ;;  %v1734_v24 = vsel %vm1672_vm0, %v1727_v15, 0.0 }
 0x1fa   : > { %v1871_v25 = vadd.f32 %v1870_v10, %v1869_v17  ;;  %v1735_v26 = vadd.f32 %v1734_v24, %v1733_v23  ;;  %v1736_v34 = vsel %vm1672_vm0, %v1726_v14, 0.0  ;;  %v1737_v35 = vsel %vm1672_vm0, %v1728_v18, 0.0  ;;  %v1768_v13 = vld [vmem:[%s4804_s12 + $0x8] sm:$0xff]  ;;  %s2073_s5 = sshll.u32 %s1611_s4, 4  ;;  %s4951_s5 = int_to_ptr.vmem [resolvable:$true] %s2073_s5 }
 0x1fb   : > { %v1738_v37 = vadd.f32 %v1737_v35, %v1736_v34  ;;  %v1739_v41 = vsel %vm1672_vm0, %v1729_v19, 0.0  ;;  %v1740_v42 = vsel %vm1672_vm0, %v1731_v21, 0.0  ;;  %v1742_v43 = vsel %vm1672_vm0, %v1730_v20, 0.0  ;;  %v1770_v34 = vld [vmem:[%s4804_s12 + $0x18] sm:$0xff] }
 0x1fc   : > { %1872 = vadd.xlane.f32.xlu1 %v1871_v25  ;;  %v1741_v47 = vadd.f32 %v1740_v42, %v1739_v41  ;;  %v1743_v48 = vsel %vm1672_vm0, %v1732_v22, 0.0  ;;  %v1745_v49 = vsel %vm4708_vm15, %v1735_v26, 0.0  ;;  %v1891_v51 = vsub.f32 %v1883_v16, %v4617_v28  ;;  %v1769_v22 = vld [vmem:[%s4804_s12 + $0x10] sm:$0xff]  ;;  %v1771_v42 = vld [vmem:[%s4804_s12 + $0x20] sm:$0xff] }
 0x1fd   : > { %v1744_v53 = vadd.f32 %v1743_v48, %v1742_v43  ;;  %v1746_v54 = vsel %vm4717_vm1, %v1738_v37, 0.0  ;;  %v1749_v55 = vsel %vm1672_vm0, %v1745_v49, 0.0  ;;  %v1892_v59 = vsub.f32 %v1884_v36, %v4619_v29 }
 0x1fe   : > { %v1747_v60 = vsel %vm4727_vm2, %v1741_v47, 0.0  ;;  %v1750_v61 = vsel %vm1672_vm0, %v1746_v54, 0.0  ;;  %v1893_v62 = vsub.f32 %v1885_v44, %v4621_v30  ;;  %v1894_v63 = vsub.f32 %v1886_v46, %v4625_v31  ;;  %v1772_v46 = vld [vmem:[%s4804_s12 + $0x28] sm:$0xff]  ;;  %v1774_v54 = vld [vmem:[%s4804_s12 + $0x38] sm:$0xff] }
 0x1ff   : > { %v1748_v0 = vsel %vm4740_vm3, %v1744_v53, 0.0  ;;  %v1751_v1 = vadd.f32 %v1750_v61, %v1749_v55  ;;  %v1752_v2 = vsel %vm1672_vm0, %v1747_v60, 0.0  ;;  %v1895_v3 = vsub.f32 %v1887_v50, %v4627_v32  ;;  %v1773_v53 = vld [vmem:[%s4804_s12 + $0x30] sm:$0xff] }
 0x200   : > { %v1754_v5 = vsel %vm1672_vm0, %v1748_v0, 0.0  ;;  %v1896_v6 = vsub.f32 %v1888_v56, %v4629_v33  ;;  %v1897_v7 = vsub.f32 %v1889_v57, %v4637_v38  ;;  %v1898_v8 = vsub.f32 %v1890_v58, %v4639_v39  ;;  %v1999_v0 = vld [vmem:[%s4844_s21] sm:$0xff] }
 0x201   : > { %v1753_v9 = vadd.f32 %v1752_v2, %v1751_v1  ;;  %v1899_v10 = vand.u32 2147483647, %v1891_v51  ;;  %v1900_v11 = vand.u32 2147483647, %v1892_v59  ;;  %v1901_v12 = vand.u32 2147483647, %v1893_v62 }
 0x202   : > { %v1902_v14 = vand.u32 2147483647, %v1894_v63  ;;  %v1903_v15 = vand.u32 2147483647, %v1895_v3  ;;  %v1904_v16 = vand.u32 2147483647, %v1896_v6  ;;  %v1775_v17 = vsub.f32 %v1767_v4, %v4617_v28 }
 0x203   : > { %v1755_v18 = vadd.f32 %v1754_v5, %v1753_v9  ;;  %v1905_v19 = vand.u32 2147483647, %v1897_v7  ;;  %v1906_v20 = vand.u32 2147483647, %v1898_v8  ;;  %v1907_v21 = vsel %vm1672_vm0, %v1899_v10, 0.0 }
 0x204   : > { %v1908_v23 = vsel %vm1672_vm0, %v1901_v12, 0.0  ;;  %v1910_v24 = vsel %vm1672_vm0, %v1900_v11, 0.0  ;;  %v1911_v25 = vsel %vm1672_vm0, %v1902_v14, 0.0  ;;  %v1913_v26 = vsel %vm1672_vm0, %v1903_v15, 0.0 }
 0x205   : > { %1756 = vadd.xlane.f32.xlu0 %v1755_v18  ;;  %v1909_v35 = vadd.f32 %v1908_v23, %v1907_v21  ;;  %v1912_v36 = vadd.f32 %v1911_v25, %v1910_v24  ;;  %v1914_v37 = vsel %vm1672_vm0, %v1905_v19, 0.0  ;;  %v1916_v41 = vsel %vm1672_vm0, %v1904_v16, 0.0  ;;  %v2000_v18 = vld [vmem:[%s4844_s21 + $0x8] sm:$0xff]  ;;  %v2002_v23 = vld [vmem:[%s4844_s21 + $0x18] sm:$0xff] }
 0x206   : > { %v1915_v43 = vadd.f32 %v1914_v37, %v1913_v26  ;;  %v1917_v44 = vsel %vm1672_vm0, %v1906_v20, 0.0  ;;  %v1776_v47 = vsub.f32 %v1768_v13, %v4619_v29  ;;  %v1777_v48 = vsub.f32 %v1769_v22, %v4621_v30  ;;  %v2001_v22 = vld [vmem:[%s4844_s21 + $0x10] sm:$0xff] }
 0x207   : > { %v1918_v49 = vadd.f32 %v1917_v44, %v1916_v41  ;;  %v1919_v50 = vsel %vm4708_vm15, %v1909_v35, 0.0  ;;  %v1920_v51 = vsel %vm4717_vm1, %v1912_v36, 0.0  ;;  %v1778_v55 = vsub.f32 %v1770_v34, %v4625_v31  ;;  %v2003_v35 = vld [vmem:[%s4844_s21 + $0x20] sm:$0xff] }
 0x208   : > { %v1921_v56 = vsel %vm4727_vm2, %v1915_v43, 0.0  ;;  %v1923_v57 = vsel %vm1672_vm0, %v1919_v50, 0.0  ;;  %v1924_v58 = vsel %vm1672_vm0, %v1920_v51, 0.0  ;;  %v1779_v59 = vsub.f32 %v1771_v42, %v4627_v32  ;;  %v2004_v42 = vld [vmem:[%s4844_s21 + $0x28] sm:$0xff] }
 0x209   : > { %v1922_v60 = vsel %vm4740_vm3, %v1918_v49, 0.0  ;;  %v1925_v61 = vadd.f32 %v1924_v58, %v1923_v57  ;;  %v1926_v62 = vsel %vm1672_vm0, %v1921_v56, 0.0  ;;  %v1780_v63 = vsub.f32 %v1772_v46, %v4629_v33 }
 0x20a   : > { %v1928_v1 = vsel %vm1672_vm0, %v1922_v60, 0.0  ;;  %v1781_v2 = vsub.f32 %v1773_v53, %v4637_v38  ;;  %v1782_v3 = vsub.f32 %v1774_v54, %v4639_v39  ;;  %v1783_v4 = vand.u32 2147483647, %v1775_v17  ;;  %v1941_v60 = vld [vmem:[%s4884_s0] sm:$0xff] }
 0x20b   : > { %v1927_v5 = vadd.f32 %v1926_v62, %v1925_v61  ;;  %v1784_v6 = vand.u32 2147483647, %v1776_v47  ;;  %v1785_v7 = vand.u32 2147483647, %v1777_v48  ;;  %v1786_v8 = vand.u32 2147483647, %v1778_v55 }
 0x20c   : > { %v1787_v9 = vand.u32 2147483647, %v1779_v59  ;;  %v1788_v10 = vand.u32 2147483647, %v1780_v63  ;;  %v1789_v11 = vand.u32 2147483647, %v1781_v2  ;;  %v2007_v12 = vsub.f32 %v1999_v0, %v4617_v28 }
 0x20d   : > { %v1929_v13 = vadd.f32 %v1928_v1, %v1927_v5  ;;  %v1790_v14 = vand.u32 2147483647, %v1782_v3  ;;  %v1791_v15 = vsel %vm1672_vm0, %v1783_v4, 0.0  ;;  %v1792_v16 = vsel %vm1672_vm0, %v1785_v7, 0.0  ;;  %v2005_v47 = vld [vmem:[%s4844_s21 + $0x30] sm:$0xff]  ;;  %v2006_v48 = vld [vmem:[%s4844_s21 + $0x38] sm:$0xff] }
 0x20e   : > { %v1793_v17 = vadd.f32 %v1792_v16, %v1791_v15  ;;  %v1794_v19 = vsel %vm1672_vm0, %v1784_v6, 0.0  ;;  %v1795_v20 = vsel %vm1672_vm0, %v1786_v8, 0.0  ;;  %v1797_v21 = vsel %vm1672_vm0, %v1787_v9, 0.0 }
 0x20f   : > { %1930 = vadd.xlane.f32.xlu1 %v1929_v13  ;;  %v1796_v24 = vadd.f32 %v1795_v20, %v1794_v19  ;;  %v1798_v25 = vsel %vm1672_vm0, %v1789_v11, 0.0  ;;  %v1800_v26 = vsel %vm1672_vm0, %v1788_v10, 0.0  ;;  %v1801_v34 = vsel %vm1672_vm0, %v1790_v14, 0.0  ;;  %v1943_v14 = vld [vmem:[%s4884_s0 + $0x10] sm:$0xff] }
 0x210   : > { %v1799_v36 = vadd.f32 %v1798_v25, %v1797_v21  ;;  %v1802_v37 = vadd.f32 %v1801_v34, %v1800_v26  ;;  %v1803_v41 = vsel %vm4708_vm15, %v1793_v17, 0.0  ;;  %v2008_v43 = vsub.f32 %v2000_v18, %v4619_v29  ;;  %v1946_v26 = vld [vmem:[%s4884_s0 + $0x28] sm:$0xff]  ;;  %v1947_v34 = vld [vmem:[%s4884_s0 + $0x30] sm:$0xff] }
 0x211   : > { %v1804_v44 = vsel %vm4717_vm1, %v1796_v24, 0.0  ;;  %v1807_v46 = vsel %vm1672_vm0, %v1803_v41, 0.0  ;;  %v2009_v49 = vsub.f32 %v2001_v22, %v4621_v30  ;;  %v2010_v50 = vsub.f32 %v2002_v23, %v4625_v31  ;;  %v1945_v23 = vld [vmem:[%s4884_s0 + $0x20] sm:$0xff] }
 0x212   : > { %v1805_v51 = vsel %vm4727_vm2, %v1799_v36, 0.0  ;;  %v1806_v53 = vsel %vm4740_vm3, %v1802_v37, 0.0  ;;  %v1808_v54 = vsel %vm1672_vm0, %v1804_v44, 0.0  ;;  %v2011_v55 = vsub.f32 %v2003_v35, %v4627_v32 }
 0x213   : > { %v1809_v56 = vadd.f32 %v1808_v54, %v1807_v46  ;;  %v1810_v57 = vsel %vm1672_vm0, %v1805_v51, 0.0  ;;  %v1812_v58 = vsel %vm1672_vm0, %v1806_v53, 0.0  ;;  %v2012_v59 = vsub.f32 %v2004_v42, %v4629_v33 }
 0x214   : > { %v2013_v61 = vsub.f32 %v2005_v47, %v4637_v38  ;;  %v2014_v62 = vsub.f32 %v2006_v48, %v4639_v39  ;;  %v2015_v63 = vand.u32 2147483647, %v2007_v12  ;;  %v2016_v0 = vand.u32 2147483647, %v2008_v43  ;;  %v1942_v12 = vld [vmem:[%s4884_s0 + $0x8] sm:$0xff]  ;;  %v1948_v43 = vld [vmem:[%s4884_s0 + $0x38] sm:$0xff] }
 0x215   : > { %v1811_v1 = vadd.f32 %v1810_v57, %v1809_v56  ;;  %v2017_v2 = vand.u32 2147483647, %v2009_v49  ;;  %v2018_v3 = vand.u32 2147483647, %v2010_v50  ;;  %v2019_v4 = vand.u32 2147483647, %v2011_v55 }
 0x216   : > { %v2020_v5 = vand.u32 2147483647, %v2012_v59  ;;  %v2021_v6 = vand.u32 2147483647, %v2013_v61  ;;  %v2022_v7 = vand.u32 2147483647, %v2014_v62  ;;  %v1949_v8 = vsub.f32 %v1941_v60, %v4617_v28 }
 0x217   : > { %v1813_v9 = vadd.f32 %v1812_v58, %v1811_v1  ;;  %v2023_v10 = vsel %vm1672_vm0, %v2015_v63, 0.0  ;;  %v2024_v11 = vsel %vm1672_vm0, %v2017_v2, 0.0  ;;  %v2026_v13 = vsel %vm1672_vm0, %v2016_v0, 0.0  ;;  %v1944_v28 = vld [vmem:[%s4884_s0 + $0x18] sm:$0xff] }
 0x218   : > { %v2025_v15 = vadd.f32 %v2024_v11, %v2023_v10  ;;  %v2027_v16 = vsel %vm1672_vm0, %v2018_v3, 0.0  ;;  %v2029_v18 = vsel %vm1672_vm0, %v2019_v4, 0.0  ;;  %v2030_v17 = vsel %vm1672_vm0, %v2021_v6, 0.0 }
 0x219   : > { %1814 = vadd.xlane.f32.xlu0 %v1813_v9  ;;  %v2028_v19 = vadd.f32 %v2027_v16, %v2026_v13  ;;  %v2031_v20 = vadd.f32 %v2030_v17, %v2029_v18  ;;  %v2032_v21 = vsel %vm1672_vm0, %v2020_v5, 0.0  ;;  %v2033_v22 = vsel %vm1672_vm0, %v2022_v7, 0.0 }
 0x21a   : > { %v2034_v24 = vadd.f32 %v2033_v22, %v2032_v21  ;;  %v2035_v25 = vsel %vm4708_vm15, %v2025_v15, 0.0  ;;  %v1950_v35 = vsub.f32 %v1942_v12, %v4619_v29  ;;  %v1951_v36 = vsub.f32 %v1943_v14, %v4621_v30 }
 0x21b   : > { %v2036_v37 = vsel %vm4717_vm1, %v2028_v19, 0.0  ;;  %v2037_v41 = vsel %vm4727_vm2, %v2031_v20, 0.0  ;;  %v2039_v42 = vsel %vm1672_vm0, %v2035_v25, 0.0  ;;  %v1952_v44 = vsub.f32 %v1944_v28, %v4625_v31 }
 0x21c   : > { %v2038_v46 = vsel %vm4740_vm3, %v2034_v24, 0.0  ;;  %v2040_v47 = vsel %vm1672_vm0, %v2036_v37, 0.0  ;;  %v2042_v29 = vsel %vm1672_vm0, %v2037_v41, 0.0  ;;  %v1953_v30 = vsub.f32 %v1945_v23, %v4627_v32 }
 0x21d   : > { %v2041_v48 = vadd.f32 %v2040_v47, %v2039_v42  ;;  %v2044_v49 = vsel %vm1672_vm0, %v2038_v46, 0.0  ;;  %v1954_v50 = vsub.f32 %v1946_v26, %v4629_v33  ;;  %v1955_v51 = vsub.f32 %v1947_v34, %v4637_v38 }
 0x21e   : > { %v1956_v53 = vsub.f32 %v1948_v43, %v4639_v39  ;;  %v1957_v54 = vand.u32 2147483647, %v1949_v8  ;;  %v1958_v31 = vand.u32 2147483647, %v1950_v35  ;;  %v1959_v55 = vand.u32 2147483647, %v1951_v36 }
 0x21f   : > { %v2043_v56 = vadd.f32 %v2042_v29, %v2041_v48  ;;  %v1960_v57 = vand.u32 2147483647, %v1952_v44  ;;  %v1961_v58 = vand.u32 2147483647, %v1953_v30  ;;  %v1962_v59 = vand.u32 2147483647, %v1954_v50 }
 0x220   : > { %v1963_v60 = vand.u32 2147483647, %v1955_v51  ;;  %v1964_v61 = vand.u32 2147483647, %v1956_v53  ;;  %v1965_v32 = vsel %vm1672_vm0, %v1957_v54, 0.0  ;;  %v1966_v62 = vsel %vm1672_vm0, %v1959_v55, 0.0 }
 0x221   : > { %v2045_v63 = vadd.f32 %v2044_v49, %v2043_v56  ;;  %v1967_v0 = vadd.f32 %v1966_v62, %v1965_v32  ;;  %v1968_v33 = vsel %vm1672_vm0, %v1958_v31, 0.0  ;;  %v1969_v38 = vsel %vm1672_vm0, %v1960_v57, 0.0 }
 0x222   : > { %v1970_v39 = vadd.f32 %v1969_v38, %v1968_v33  ;;  %v1971_v1 = vsel %vm1672_vm0, %v1961_v58, 0.0  ;;  %v1972_v2 = vsel %vm1672_vm0, %v1963_v60, 0.0  ;;  %v1974_v3 = vsel %vm1672_vm0, %v1962_v59, 0.0 }
 0x223   : > { %2046 = vadd.xlane.f32.xlu1 %v2045_v63  ;;  %v1973_v4 = vadd.f32 %v1972_v2, %v1971_v1  ;;  %v1975_v5 = vsel %vm1672_vm0, %v1964_v61, 0.0  ;;  %v1977_v6 = vsel %vm4708_vm15, %v1967_v0, 0.0 }
 0x224   : > { %v1976_v7 = vadd.f32 %v1975_v5, %v1974_v3  ;;  %v1978_v8 = vsel %vm4717_vm1, %v1970_v39, 0.0  ;;  %v1981_v9 = vsel %vm1672_vm0, %v1977_v6, 0.0 }
 0x225   : > { %v1979_v10 = vsel %vm4727_vm2, %v1973_v4, 0.0  ;;  %v1982_v11 = vsel %vm1672_vm0, %v1978_v8, 0.0 }
 0x226   : > { %v1980_v13 = vsel %vm4740_vm3, %v1976_v7, 0.0  ;;  %v1983_v12 = vadd.f32 %v1982_v11, %v1981_v9  ;;  %v1984_v14 = vsel %vm1672_vm0, %v1979_v10, 0.0 }
 0x227   : > { %v1986_v27 = vsel %vm1672_vm0, %v1980_v13, 0.0 }
 0x228   : > { %v1985_v15 = vadd.f32 %v1984_v14, %v1983_v12 }
 0x22a   : > { %v1987_v16 = vadd.f32 %v1986_v27, %v1985_v15 }
 0x22c   : > { %1988 = vadd.xlane.f32.xlu0 %v1987_v16 }
 0x289   : > { %v1873_v28 = vpop.xlane.xlu1 %1872 }
 0x28a   : > { %v1874_v52 = vrot.slane %v1873_v28, 4 }
 0x28c   : > { %v1875_v25 = vadd.f32 %v1874_v52, %v1873_v28 }
 0x28e   : > { %v1876_v34 = vrot.slane %v1875_v25, 2 }
 0x290   : > { %v1877_v42 = vadd.f32 %v1876_v34, %v1875_v25 }
 0x292   : > { %v1757_v40 = vpop.xlane.xlu0 %1756  ;;  %v1878_v47 = vrot.slane %v1877_v42, 1 }
 0x293   : > { %v1758_v18 = vrot.slane %v1757_v40, 4 }
 0x294   : > { %v1879_v51 = vadd.f32 %v1878_v47, %v1877_v42 }
 0x295   : > { %v1759_v17 = vadd.f32 %v1758_v18, %v1757_v40 }
 0x297   : > { %v1760_v19 = vrot.slane %v1759_v17, 2 }
 0x299   : > { %v1761_v45 = vadd.f32 %v1760_v19, %v1759_v17 }
 0x29b   : > { %v1762_v20 = vrot.slane %v1761_v45, 1 }
 0x29c   : > { %v1931_v21 = vpop.xlane.xlu1 %1930 }
 0x29d   : > { %v1932_v22 = vrot.slane %v1931_v21, 4  ;;  %v1763_v23 = vadd.f32 %v1762_v20, %v1761_v45 }
 0x29f   : > { %2810 = vpush %v1763_v23  ;;  %v1933_v24 = vadd.f32 %v1932_v22, %v1931_v21 }
 0x2a1   : > { %v1934_v26 = vrot.slane %v1933_v24, 2 }
 0x2a3   : > { %v1935_v41 = vadd.f32 %v1934_v26, %v1933_v24 }
 0x2a5   : > { %v1936_v46 = vrot.slane %v1935_v41, 1 }
 0x2a6   : > { %v1815_v35 = vpop.xlane.xlu0 %1814 }
 0x2a7   : > { %v1816_v36 = vrot.slane %v1815_v35, 4  ;;  %v1937_v50 = vadd.f32 %v1936_v46, %v1935_v41 }
 0x2a9   : > { %v1817_v37 = vadd.f32 %v1816_v36, %v1815_v35 }
 0x2ab   : > { %v1818_v43 = vrot.slane %v1817_v37, 2 }
 0x2ad   : > { %v1819_v44 = vadd.f32 %v1818_v43, %v1817_v37 }
 0x2af   : > { %v1820_v29 = vrot.slane %v1819_v44, 1 }
 0x2b0   : > { %v2047_v30 = vpop.xlane.xlu1 %2046 }
 0x2b1   : > { %v2048_v48 = vrot.slane %v2047_v30, 4  ;;  %v1821_v49 = vadd.f32 %v1820_v29, %v1819_v44 }
 0x2b3   : > { %v2049_v53 = vadd.f32 %v2048_v48, %v2047_v30  ;;  %2812 = vpush %v1821_v49 }
 0x2b4   : > { %2814 = vpush %v1879_v51 }
 0x2b5   : > { %2816 = vpush %v1937_v50  ;;  %v2050_v54 = vrot.slane %v2049_v53, 2 }
 0x2b7   : > { %v2051_v56 = vadd.f32 %v2050_v54, %v2049_v53 }
 0x2b9   : > { %v1989_v31 = vpop.xlane.xlu0 %1988  ;;  %v2052_v59 = vrot.slane %v2051_v56, 1 }
 0x2ba   : > { %v1990_v55 = vrot.slane %v1989_v31, 4 }
 0x2bb   : > { %v2053_v32 = vadd.f32 %v2052_v59, %v2051_v56 }
 0x2bc   : > { %v1991_v57 = vadd.f32 %v1990_v55, %v1989_v31 }
 0x2be   : > { %v1992_v58 = vrot.slane %v1991_v57, 2 }
 0x2c0   : > { %v1993_v60 = vadd.f32 %v1992_v58, %v1991_v57 }
 0x2c2   : > { %v1994_v61 = vrot.slane %v1993_v60, 1 }
 0x2c4   : > { %v1995_v62 = vadd.f32 %v1994_v61, %v1993_v60 }
 0x2c6   : > { %2818 = vpush %v1995_v62 }
 0x2c7   : > { %2820 = vpush %v2053_v32 }
 0x2d0   : > { %s2811_s23 = spop %2810 }
 0x2d1   : > { %s1765_s25 = smul.f32 0.000256, %s2811_s23 }
 0x2e4   : > { %s2813_s26 = spop %2812 }
 0x2e5   : > { %s1823_s22 = smul.f32 0.00032, %s2813_s26  ;;  %s2815_s19 = spop %2814 }
 0x2e6   : > { %s1881_s13 = smul.f32 0.0004, %s2815_s19  ;;  %s2817_s24 = spop %2816 }
 0x2e7   : > { %s1824_s18 = sadd.f32 %s1823_s22, %s1765_s25  ;;  %s1939_s12 = smul.f32 0.0005, %s2817_s24 }
 0x2e8   : > { %s4949_s22 = scalar_lea.hbm %s5001_s8, %s2783_s3  ;;  %s2060_s25 = scalar_lea.sflag [#allocation11], %s4609_s15 }
 0x2e9   : > { %s1882_s10 = sadd.f32 %s1881_s13, %s1824_s18  ;;  %s3373_s19 = scalar_lea.vmem %s4951_s5, 128 }
 0x2ea   : > { %p3374_p2 = scmp.ne.s32.totalorder %s4951_s5, %s3373_s19 }
 0x2eb   : > { %s1940_s21 = sadd.f32 %s1939_s12, %s1882_s10 }
 0x2ec   : > { %p3375_p5 = pnand %p3374_p2, %p4038_p6 }
 0x2ee   : > { %p3376_p3 = pneg %p3375_p5 }
 0x2f7   : > { %s2819_s0 = spop %2818 }
 0x2f8   : > { %s1997_s1 = smul.f32 0.000625, %s2819_s0  ;;  %s2821_s2 = spop %2820 }
 0x2f9   : > { %s2055_s7 = smul.f32 0.00078125, %s2821_s2 }
 0x2fa   : > { %s1998_s6 = sadd.f32 %s1997_s1, %s1940_s21  ;;  %s3949_s1 = smov [#allocation10]  }
 0x2fb   : > { %s3377_s2 = sshll.u32 %s3949_s1, 4  ;;  %s3378_s2 = int_to_ptr.vmem [resolvable:$false] %s3377_s2 }
 0x2fc   : > { %s2056_s26 = sadd.f32 %s2055_s7, %s1998_s6  ;;  %s3379_s6 = scalar_lea.vmem %s3378_s2, 256 }
 0x2fd   : > { %p3380_p4 = scmp.lt.s32.totalorder %s4951_s5, %s3378_s2  ;;  %p3381_p7 = scmp.lt.s32.totalorder %s3379_s6, %s3373_s19 }
 0x2fe   : > { %v2057_v63 = vstv %s2056_s26 }
 0x2ff   : > { %2058 = vst [vmem:[%s1611_s4] sm:$0xff] %v2057_v63  ;;  %p3382_p10 = por %p3381_p7, %p3380_p4 }
 0x301   : > { %p3383_p11 = pnand %p3382_p10, %p3376_p3 }
 0x303   : > { %3386 = shalt.err (!%p3383_p11)
}
 0x304   : > { %s3387_s3 = scalar_lea.hbm %s4949_s22, 128  ;;  %s3391_s9 = scalar_lea.hbm %s5001_s8, 256 }
 0x305   : > { %p3388_p12 = scmp.ne.s32.totalorder %s4949_s22, %s3387_s3  ;;  %p3392_p1 = scmp.lt.u32.totalorder %s4949_s22, %s5001_s8 }
 0x306   : > { %p3393_p2 = scmp.lt.u32.totalorder %s3391_s9, %s3387_s3  ;;  %p3395_p3 = scmp.lt.u32.totalorder %s3387_s3, %s4949_s22 }
 0x307   : > { %p3389_p13 = pnand %p3388_p12, %p4038_p6 }
 0x308   : > { %p3394_p5 = por %p3393_p2, %p3392_p1 }
 0x309   : > { %p3390_p0 = pneg %p3389_p13 }
 0x30a   : > { %p3396_p4 = por %p3395_p3, %p3394_p5 }
 0x30c   : > { %p3397_p7 = pnand %p3396_p4, %p3390_p0 }
 0x30e   : > { %3400 = shalt.err (!%p3397_p7)
}
 0x30f   : > { %2822 = dma.vmem_to_hbm [thread:$0]  (%p4038_p6), %s4951_s5, 128, %s4949_s22, %s2060_s25  }
 0x310 PF: > { %s2085_s18 = sand.u32 1, %s3679_s27   ;;  %p2825_p10 = pnand %p2650_p9, %p4042_p8 }
 0x311   : > { %s2086_s13 = scalar_lea.sflag [#allocation11], %s2085_s18 }
 0x312   : > { %3674 = dma.done.wait (!%p2825_p10), %s2086_s13, 128  }
 0x313   : > { %3676 = vsyncadd (!%p2825_p10), %s2086_s13, 4294967168  ;;  %s5080_s24 = sld [smem:[#allocation13_spill]]  ;;  %p18_p11 = scmp.ge.s32.totalorder %s4020_s11, 4  }
 0x314   : > { %s5081_s27 = smov %s3683_s28  ;;  %s5082_s28 = smov %s3687_s29 }
 0x315   : > { %s5084_s30 = smov %s4020_s11  ;;  %20 = sbr.rel (!%p18_p11) target bundleno = 12 (0xc), region = 804 }
 0x319   : > { %s5083_s29 = smov %s5080_s24 }
 0x31c   :  { %2091 = vsyncpa [#allocation11], 1 }
 0x31d   :  { %2093 = vsyncpa [#allocation11 + $0x1], 1 }

</bundles_post_ra>
